<compile_context>
chip_gen: v6e
topology: v6e:2x2x1
jax: 0.10.0
libtpu: 0.0.40
codegen_flags: <defaults>
</compile_context>

<pallas_src>
import jax
import jax.numpy as jnp
import numpy as np
from jax import lax
from jax.experimental import pallas as pl
from jax.experimental.pallas import tpu as pltpu

KSIZE = 7
PAD = (KSIZE - 1) // 2
EPS = 1e-5


def _sigmoid(v):
    # One EUP transcendental, no exp-overflow edge case.
    return 0.5 * jnp.tanh(0.5 * v) + 0.5


def _wrapped_group_max(v, group):
    """v: (rows, n).  Returns w with w[:, i] = max{ v[:, j] : j % group == i % group }.

    Uses only full-wrap rotations, so the result is independent of the roll
    direction convention.  Requires n // group to be a power of two.
    """
    n = v.shape[-1]
    s = group
    while s < n:
        v = jnp.maximum(v, pltpu.roll(v, s, axis=1))
        s *= 2
    return v


def _mytca_kernel(x_hw_ref, x_wh_ref, wavg_ref, wmax_ref, bns_ref, bnb_ref,
                  wh_ref, ww_ref, apool_ref, srow_ref, scol_ref,
                  eh_ref, ew_ref, tmax_ref, tmean_ref, cmean_ref, out_ref):
    bb, C, HW = x_hw_ref.shape
    H = eh_ref.shape[0]
    W = ew_ref.shape[0]
    oup = wh_ref.shape[0] // bb
    f32 = jnp.float32

    x_blk = x_hw_ref[...]                        # (bb, C, HW), lane-dense
    x2 = x_blk.reshape(bb * C, HW)               # leading-dim merge: free
    xw2 = x_wh_ref[...].reshape(bb * C, HW)      # W-major flattening of same data

    # ---- coordinate pooling -------------------------------------------------
    x_avg = jnp.dot(x2, apool_ref[...], preferred_element_type=f32)        # (bb*C, H+W)
    row_max = _wrapped_group_max(xw2, H)         # lane i -> max over w of row i % H
    col_max = _wrapped_group_max(x2, W)          # lane i -> max over h of col i % W
    x_max = (jnp.dot(row_max, srow_ref[...], preferred_element_type=f32) +
             jnp.dot(col_max, scol_ref[...], preferred_element_type=f32))  # (bb*C, H+W)

    # ---- conv1 (1x2) + folded BatchNorm (inference) + h_swish ---------------
    y1 = (jnp.dot(wavg_ref[...], x_avg, preferred_element_type=f32) +
          jnp.dot(wmax_ref[...], x_max, preferred_element_type=f32))       # (bb*mip, H+W)
    y1 = y1 * bns_ref[...] + bnb_ref[...]
    y1 = y1 * (jnp.clip(y1 + 3.0, 0.0, 6.0) * (1.0 / 6.0))

    # ---- 1x1 convs + sigmoid, then replicate back to all H*W positions ------
    a_h = _sigmoid(jnp.dot(wh_ref[...], y1[:, :H],
                           preferred_element_type=f32))                     # (bb*oup, H)
    a_w = _sigmoid(jnp.dot(ww_ref[...], y1[:, H:],
                           preferred_element_type=f32))                     # (bb*oup, W)
    chan_att = (jnp.dot(a_h, eh_ref[...], preferred_element_type=f32) *
                jnp.dot(a_w, ew_ref[...], preferred_element_type=f32))      # (bb*oup, HW)
    chan_att = chan_att.reshape(bb, oup, HW)

    # ---- spatial attention: channel max/mean + 7x7 conv as Toeplitz matmuls -
    ch_max = jnp.max(x_blk, axis=1)                                         # (bb, HW)
    ch_mean = jnp.dot(cmean_ref[...], x2, preferred_element_type=f32)       # (bb, HW)
    sa = _sigmoid(jnp.dot(ch_max, tmax_ref[...], preferred_element_type=f32) +
                  jnp.dot(ch_mean, tmean_ref[...], preferred_element_type=f32))

    # ---- fused epilogue: identity * a_h * a_w * sa, lane-dense store --------
    out_ref[...] = (x_blk * chan_att * sa[:, None, :]).astype(out_ref.dtype)


def _pick_bb(B, C, HW, dtype_bytes=4):
    """Batch-block size: keep >= ~8 grid steps and a small VMEM footprint."""
    bb = max(1, B // 8)
    while B % bb:
        bb -= 1
    budget = 8 * 1024 * 1024                    # conservative for v5e/v7x scoped VMEM
    per_unit = 2 * 3 * C * HW * dtype_bytes     # double-buffered x_hw + x_wh + out
    while bb > 1 and bb * per_unit > budget:
        bb -= 1
        while B % bb:
            bb -= 1
    return bb


def _block_diag(m, n):
    r, c = m.shape
    out = np.zeros((n * r, n * c), np.float32)
    for i in range(n):
        out[i * r:(i + 1) * r, i * c:(i + 1) * c] = m
    return out


def _prepare_kernel_params(raw, C, H, W, bb):
    conv1_w, gamma, beta, run_mean, run_var, conv_h_w, conv_w_w, sa_w = (
        np.asarray(a, np.float32) for a in raw)
    mip = conv1_w.shape[0]
    HW = H * W

    # Fold BatchNorm (inference mode) into a per-channel scale/bias.
    scale = gamma / np.sqrt(run_var + EPS)
    bias = beta - run_mean * scale

    w_avg_bd = _block_diag(conv1_w[:, :, 0, 0], bb)          # (bb*mip, bb*C)
    w_max_bd = _block_diag(conv1_w[:, :, 0, 1], bb)
    w_h_bd = _block_diag(conv_h_w[:, :, 0, 0], bb)           # (bb*oup, bb*mip)
    w_w_bd = _block_diag(conv_w_w[:, :, 0, 0], bb)
    bn_s_bd = np.tile(scale, bb).reshape(bb * mip, 1)
    bn_b_bd = np.tile(bias, bb).reshape(bb * mip, 1)

    # Averaging matrix and max-selection matrices (columns 0..H-1 = per-row
    # stats, columns H..H+W-1 = per-column stats, matching the torch cat order).
    a_pool = np.zeros((HW, H + W), np.float32)
    s_row = np.zeros((HW, H + W), np.float32)
    s_col = np.zeros((HW, H + W), np.float32)
    for hh in range(H):
        for ww in range(W):
            a_pool[hh * W + ww, hh] = 1.0 / W
            a_pool[hh * W + ww, H + ww] = 1.0 / H
    for hh in range(H):
        s_row[hh, hh] = 1.0            # row-max tree (W-major layout): lane h -> row h
    for ww in range(W):
        s_col[ww, H + ww] = 1.0        # col-max tree (H-major layout): lane w -> col w

    # Replication matrices expanding a_h(H) / a_w(W) to all H*W positions.
    e_h = np.zeros((H, HW), np.float32)
    e_w = np.zeros((W, HW), np.float32)
    for hh in range(H):
        e_h[hh, hh * W:(hh + 1) * W] = 1.0
    for ww in range(W):
        e_w[ww, ww::W] = 1.0

    # 7x7 padded conv as a (HW, HW) Toeplitz matrix per pooled channel.
    t = np.zeros((2, HW, HW), np.float32)
    for ch in range(2):
        for hh in range(H):
            for ww in range(W):
                for ky in range(KSIZE):
                    for kx in range(KSIZE):
                        ih, iw = hh + ky - PAD, ww + kx - PAD
                        if 0 <= ih < H and 0 <= iw < W:
                            t[ch, ih * W + iw, hh * W + ww] = sa_w[0, ch, ky, kx]

    c_mean = _block_diag(np.full((1, C), 1.0 / C, np.float32), bb)  # (bb, bb*C)

    arrs = (w_avg_bd, w_max_bd, bn_s_bd, bn_b_bd, w_h_bd, w_w_bd,
            a_pool, s_row, s_col, e_h, e_w, t[0], t[1], c_mean)
    return tuple(jnp.asarray(a) for a in arrs)


def mytca02_forward(x, raw):
    B, C, H, W = x.shape
    HW = H * W
    assert HW % 128 == 0 and C % 8 == 0, "block must satisfy the (8,128) rule"
    assert (H & (H - 1)) == 0 and (W & (W - 1)) == 0, "roll trees need pow2 H, W"
    oup = raw[5].shape[0]
    assert oup == C, "module broadcast requires oup == inp"

    bb = _pick_bb(B, C, HW)
    (w_avg_bd, w_max_bd, bn_s_bd, bn_b_bd, w_h_bd, w_w_bd,
     a_pool, s_row, s_col, e_h, e_w, t_max, t_mean, c_mean) = (
        _prepare_kernel_params(raw, C, H, W, bb))
    mip = w_avg_bd.shape[0] // bb

    x_hw = x.reshape(B, C, HW)                                 # lane-dense, free
    x_wh = jnp.transpose(x, (0, 1, 3, 2)).reshape(B, C, HW)    # W-major copy (tiny)

    const2 = lambda b: (0, 0)
    out = pl.pallas_call(
        _mytca_kernel,
        out_shape=jax.ShapeDtypeStruct((B, C, HW), x.dtype),
        grid=(B // bb,),
        in_specs=[
            pl.BlockSpec((bb, C, HW), lambda b: (b, 0, 0)),
            pl.BlockSpec((bb, C, HW), lambda b: (b, 0, 0)),
            pl.BlockSpec((bb * mip, bb * C), const2),
            pl.BlockSpec((bb * mip, bb * C), const2),
            pl.BlockSpec((bb * mip, 1), const2),
            pl.BlockSpec((bb * mip, 1), const2),
            pl.BlockSpec((bb * oup, bb * mip), const2),
            pl.BlockSpec((bb * oup, bb * mip), const2),
            pl.BlockSpec((HW, H + W), const2),
            pl.BlockSpec((HW, H + W), const2),
            pl.BlockSpec((HW, H + W), const2),
            pl.BlockSpec((H, HW), const2),
            pl.BlockSpec((W, HW), const2),
            pl.BlockSpec((HW, HW), const2),
            pl.BlockSpec((HW, HW), const2),
            pl.BlockSpec((bb, bb * C), const2),
        ],
        out_specs=pl.BlockSpec((bb, C, HW), lambda b: (b, 0, 0)),
        compiler_params=pltpu.CompilerParams(
            dimension_semantics=("parallel",)),
    )(x_hw, x_wh, w_avg_bd, w_max_bd, bn_s_bd, bn_b_bd, w_h_bd, w_w_bd,
      a_pool, s_row, s_col, e_h, e_w, t_max, t_mean, c_mean)
    return out.reshape(B, C, H, W)


def init_params(key, inp=32, oup=32, reduction=16):
    mip = max(8, inp // reduction)
    ks = jax.random.split(key, 8)

    def rnd(k, shape, fan_in):
        bound = 1.0 / np.sqrt(fan_in)
        return jax.random.uniform(k, shape, jnp.float32, -bound, bound)

    conv1_w = rnd(ks[0], (mip, inp, 1, 2), inp * 2)              # Conv2d(inp, mip, (1,2))
    conv_h_w = rnd(ks[1], (oup, mip, 1, 1), mip)                 # Conv2d(mip, oup, 1)
    conv_w_w = rnd(ks[2], (oup, mip, 1, 1), mip)                 # Conv2d(mip, oup, 1)
    sa_w = rnd(ks[3], (1, 2, KSIZE, KSIZE), 2 * KSIZE * KSIZE)   # Conv2d(2, 1, 7)
    gamma = jax.random.uniform(ks[4], (mip,), jnp.float32, 0.5, 1.5)
    beta = jax.random.uniform(ks[5], (mip,), jnp.float32, -0.5, 0.5)
    run_mean = jax.random.uniform(ks[6], (mip,), jnp.float32, -0.5, 0.5)
    run_var = jax.random.uniform(ks[7], (mip,), jnp.float32, 0.5, 1.5)
    return (conv1_w, gamma, beta, run_mean, run_var, conv_h_w, conv_w_w, sa_w)


def reference_forward(x, raw):
    """Plain-JAX reference mirroring the PyTorch forward (inference-mode BN)."""
    conv1_w, gamma, beta, run_mean, run_var, conv_h_w, conv_w_w, sa_w = raw
    B, C, H, W = x.shape
    dn = ("NCHW", "OIHW", "NCHW")

    x_ha = jnp.mean(x, axis=3)
    x_hm = jnp.max(x, axis=3)
    x_wa = jnp.mean(x, axis=2)
    x_wm = jnp.max(x, axis=2)
    x_h = jnp.stack([x_ha, x_hm], axis=-1)                       # (B,C,H,2)
    x_w = jnp.stack([x_wa, x_wm], axis=-1)                       # (B,C,W,2)
    y1_in = jnp.concatenate([x_h, x_w], axis=2)                  # (B,C,H+W,2)

    y1 = lax.conv_general_dilated(y1_in, conv1_w, (1, 1), "VALID",
                                  dimension_numbers=dn)          # (B,mip,H+W,1)
    scale = gamma / jnp.sqrt(run_var + EPS)
    bias = beta - run_mean * scale
    y1 = y1 * scale[None, :, None, None] + bias[None, :, None, None]
    y1 = y1 * jnp.clip(y1 + 3.0, 0.0, 6.0) / 6.0

    y_h = y1[:, :, :H, :]                                        # (B,mip,H,1)
    y_w = jnp.transpose(y1[:, :, H:, :], (0, 1, 3, 2))           # (B,mip,1,W)
    a_h = jax.nn.sigmoid(lax.conv_general_dilated(y_h, conv_h_w, (1, 1), "VALID",
                                                  dimension_numbers=dn))
    a_w = jax.nn.sigmoid(lax.conv_general_dilated(y_w, conv_w_w, (1, 1), "VALID",
                                                  dimension_numbers=dn))

    sa_in = jnp.stack([jnp.max(x, axis=1), jnp.mean(x, axis=1)], axis=1)
    sa = jax.nn.sigmoid(lax.conv_general_dilated(sa_in, sa_w, (1, 1),
                                                 ((PAD, PAD), (PAD, PAD)),
                                                 dimension_numbers=dn))
    return ((x * a_h) * a_w) * sa


if __name__ == "__main__":
    key = jax.random.PRNGKey(0)
    k_x, k_p = jax.random.split(key)

    B, C, H, W = 2, 32, 16, 16                # inp = oup = 32, reduction = 16
    x = jax.random.normal(k_x, (B, C, H, W), jnp.float32)
    raw = init_params(k_p, inp=C, oup=C, reduction=16)

    out = mytca02_forward(x, raw)
    out = jax.block_until_ready(out)

    ref = reference_forward(x, raw)
    np.testing.assert_allclose(np.asarray(out), np.asarray(ref),
                               rtol=1e-3, atol=1e-4)
    print("KERNEL_OK")
</pallas_src>

<mosaic_0001>
module attributes {stable_mosaic.version = 11 : i64} {
  func.func @_mytca_kernel(%arg0: i32, %arg1: memref<1x32x256xf32, #tpu.memory_space<vmem>>, %arg2: memref<1x32x256xf32, #tpu.memory_space<vmem>>, %arg3: memref<8x32xf32, #tpu.memory_space<vmem>>, %arg4: memref<8x32xf32, #tpu.memory_space<vmem>>, %arg5: memref<8x1xf32, #tpu.memory_space<vmem>>, %arg6: memref<8x1xf32, #tpu.memory_space<vmem>>, %arg7: memref<32x8xf32, #tpu.memory_space<vmem>>, %arg8: memref<32x8xf32, #tpu.memory_space<vmem>>, %arg9: memref<256x32xf32, #tpu.memory_space<vmem>>, %arg10: memref<256x32xf32, #tpu.memory_space<vmem>>, %arg11: memref<256x32xf32, #tpu.memory_space<vmem>>, %arg12: memref<16x256xf32, #tpu.memory_space<vmem>>, %arg13: memref<16x256xf32, #tpu.memory_space<vmem>>, %arg14: memref<256x256xf32, #tpu.memory_space<vmem>>, %arg15: memref<256x256xf32, #tpu.memory_space<vmem>>, %arg16: memref<1x32xf32, #tpu.memory_space<vmem>>, %arg17: memref<1x32x256xf32, #tpu.memory_space<vmem>>) attributes {dimension_semantics = [#tpu.dimension_semantics<parallel>], iteration_bounds = array<i64: 2>, scalar_prefetch = 0 : i64, scratch_operands = 0 : i64, tpu.core_type = #tpu.core_type<tc>, window_params = [{transform_indices = @transform_0, window_bounds = array<i64: 1, 32, 256>}, {transform_indices = @transform_1, window_bounds = array<i64: 1, 32, 256>}, {pipeline_mode = #tpu.pipeline_mode<synchronous>, transform_indices = @transform_2, window_bounds = array<i64: 8, 32>}, {pipeline_mode = #tpu.pipeline_mode<synchronous>, transform_indices = @transform_3, window_bounds = array<i64: 8, 32>}, {pipeline_mode = #tpu.pipeline_mode<synchronous>, transform_indices = @transform_4, window_bounds = array<i64: 8, 1>}, {pipeline_mode = #tpu.pipeline_mode<synchronous>, transform_indices = @transform_5, window_bounds = array<i64: 8, 1>}, {pipeline_mode = #tpu.pipeline_mode<synchronous>, transform_indices = @transform_6, window_bounds = array<i64: 32, 8>}, {pipeline_mode = #tpu.pipeline_mode<synchronous>, transform_indices = @transform_7, window_bounds = array<i64: 32, 8>}, {pipeline_mode = #tpu.pipeline_mode<synchronous>, transform_indices = @transform_8, window_bounds = array<i64: 256, 32>}, {pipeline_mode = #tpu.pipeline_mode<synchronous>, transform_indices = @transform_9, window_bounds = array<i64: 256, 32>}, {pipeline_mode = #tpu.pipeline_mode<synchronous>, transform_indices = @transform_10, window_bounds = array<i64: 256, 32>}, {pipeline_mode = #tpu.pipeline_mode<synchronous>, transform_indices = @transform_11, window_bounds = array<i64: 16, 256>}, {pipeline_mode = #tpu.pipeline_mode<synchronous>, transform_indices = @transform_12, window_bounds = array<i64: 16, 256>}, {pipeline_mode = #tpu.pipeline_mode<synchronous>, transform_indices = @transform_13, window_bounds = array<i64: 256, 256>}, {pipeline_mode = #tpu.pipeline_mode<synchronous>, transform_indices = @transform_14, window_bounds = array<i64: 256, 256>}, {pipeline_mode = #tpu.pipeline_mode<synchronous>, transform_indices = @transform_15, window_bounds = array<i64: 1, 32>}, {transform_indices = @transform_16, window_bounds = array<i64: 1, 32, 256>}]} {
    %c0 = arith.constant 0 : index
    %c0_0 = arith.constant 0 : index
    %c0_1 = arith.constant 0 : index
    %0 = vector.load %arg1[%c0, %c0_0, %c0_1] : memref<1x32x256xf32, #tpu.memory_space<vmem>>, vector<1x32x256xf32>
    %1 = vector.shape_cast %0 : vector<1x32x256xf32> to vector<32x256xf32>
    %c0_2 = arith.constant 0 : index
    %c0_3 = arith.constant 0 : index
    %c0_4 = arith.constant 0 : index
    %2 = vector.load %arg2[%c0_2, %c0_3, %c0_4] : memref<1x32x256xf32, #tpu.memory_space<vmem>>, vector<1x32x256xf32>
    %3 = vector.shape_cast %2 : vector<1x32x256xf32> to vector<32x256xf32>
    %c0_5 = arith.constant 0 : index
    %c0_6 = arith.constant 0 : index
    %4 = vector.load %arg9[%c0_5, %c0_6] : memref<256x32xf32, #tpu.memory_space<vmem>>, vector<256x32xf32>
    %cst = arith.constant dense<0.000000e+00> : vector<32x32xf32>
    %5 = tpu.matmul %1, %4, %cst {dimension_numbers = #tpu.dot_dimension_numbers<[1], [0], [0], [1], [0, 0, 1, 1], [], []>} : vector<32x256xf32>, vector<256x32xf32>, vector<32x32xf32> -> vector<32x32xf32>
    %c16_i32 = arith.constant 16 : i32
    %6 = tpu.dynamic_rotate %3 by %c16_i32 dim 1 : vector<32x256xf32>, i32 -> vector<32x256xf32>
    %7 = arith.maximumf %3, %6 : vector<32x256xf32>
    %c32_i32 = arith.constant 32 : i32
    %8 = tpu.dynamic_rotate %7 by %c32_i32 dim 1 : vector<32x256xf32>, i32 -> vector<32x256xf32>
    %9 = arith.maximumf %7, %8 : vector<32x256xf32>
    %c64_i32 = arith.constant 64 : i32
    %10 = tpu.dynamic_rotate %9 by %c64_i32 dim 1 : vector<32x256xf32>, i32 -> vector<32x256xf32>
    %11 = arith.maximumf %9, %10 : vector<32x256xf32>
    %c128_i32 = arith.constant 128 : i32
    %12 = tpu.dynamic_rotate %11 by %c128_i32 dim 1 : vector<32x256xf32>, i32 -> vector<32x256xf32>
    %13 = arith.maximumf %11, %12 : vector<32x256xf32>
    %c16_i32_7 = arith.constant 16 : i32
    %14 = tpu.dynamic_rotate %1 by %c16_i32_7 dim 1 : vector<32x256xf32>, i32 -> vector<32x256xf32>
    %15 = arith.maximumf %1, %14 : vector<32x256xf32>
    %c32_i32_8 = arith.constant 32 : i32
    %16 = tpu.dynamic_rotate %15 by %c32_i32_8 dim 1 : vector<32x256xf32>, i32 -> vector<32x256xf32>
    %17 = arith.maximumf %15, %16 : vector<32x256xf32>
    %c64_i32_9 = arith.constant 64 : i32
    %18 = tpu.dynamic_rotate %17 by %c64_i32_9 dim 1 : vector<32x256xf32>, i32 -> vector<32x256xf32>
    %19 = arith.maximumf %17, %18 : vector<32x256xf32>
    %c128_i32_10 = arith.constant 128 : i32
    %20 = tpu.dynamic_rotate %19 by %c128_i32_10 dim 1 : vector<32x256xf32>, i32 -> vector<32x256xf32>
    %21 = arith.maximumf %19, %20 : vector<32x256xf32>
    %c0_11 = arith.constant 0 : index
    %c0_12 = arith.constant 0 : index
    %22 = vector.load %arg10[%c0_11, %c0_12] : memref<256x32xf32, #tpu.memory_space<vmem>>, vector<256x32xf32>
    %cst_13 = arith.constant dense<0.000000e+00> : vector<32x32xf32>
    %23 = tpu.matmul %13, %22, %cst_13 {dimension_numbers = #tpu.dot_dimension_numbers<[1], [0], [0], [1], [0, 0, 1, 1], [], []>} : vector<32x256xf32>, vector<256x32xf32>, vector<32x32xf32> -> vector<32x32xf32>
    %c0_14 = arith.constant 0 : index
    %c0_15 = arith.constant 0 : index
    %24 = vector.load %arg11[%c0_14, %c0_15] : memref<256x32xf32, #tpu.memory_space<vmem>>, vector<256x32xf32>
    %cst_16 = arith.constant dense<0.000000e+00> : vector<32x32xf32>
    %25 = tpu.matmul %21, %24, %cst_16 {dimension_numbers = #tpu.dot_dimension_numbers<[1], [0], [0], [1], [0, 0, 1, 1], [], []>} : vector<32x256xf32>, vector<256x32xf32>, vector<32x32xf32> -> vector<32x32xf32>
    %26 = arith.addf %23, %25 : vector<32x32xf32>
    %c0_17 = arith.constant 0 : index
    %c0_18 = arith.constant 0 : index
    %27 = vector.load %arg3[%c0_17, %c0_18] : memref<8x32xf32, #tpu.memory_space<vmem>>, vector<8x32xf32>
    %cst_19 = arith.constant dense<0.000000e+00> : vector<8x32xf32>
    %28 = tpu.matmul %27, %5, %cst_19 {dimension_numbers = #tpu.dot_dimension_numbers<[1], [0], [0], [1], [0, 0, 1, 1], [], []>} : vector<8x32xf32>, vector<32x32xf32>, vector<8x32xf32> -> vector<8x32xf32>
    %c0_20 = arith.constant 0 : index
    %c0_21 = arith.constant 0 : index
    %29 = vector.load %arg4[%c0_20, %c0_21] : memref<8x32xf32, #tpu.memory_space<vmem>>, vector<8x32xf32>
    %cst_22 = arith.constant dense<0.000000e+00> : vector<8x32xf32>
    %30 = tpu.matmul %29, %26, %cst_22 {dimension_numbers = #tpu.dot_dimension_numbers<[1], [0], [0], [1], [0, 0, 1, 1], [], []>} : vector<8x32xf32>, vector<32x32xf32>, vector<8x32xf32> -> vector<8x32xf32>
    %31 = arith.addf %28, %30 : vector<8x32xf32>
    %c0_23 = arith.constant 0 : index
    %c0_24 = arith.constant 0 : index
    %32 = vector.load %arg5[%c0_23, %c0_24] : memref<8x1xf32, #tpu.memory_space<vmem>>, vector<8x1xf32>
    %33 = vector.broadcast %32 : vector<8x1xf32> to vector<8x32xf32>
    %34 = arith.mulf %31, %33 : vector<8x32xf32>
    %c0_25 = arith.constant 0 : index
    %c0_26 = arith.constant 0 : index
    %35 = vector.load %arg6[%c0_25, %c0_26] : memref<8x1xf32, #tpu.memory_space<vmem>>, vector<8x1xf32>
    %36 = vector.broadcast %35 : vector<8x1xf32> to vector<8x32xf32>
    %37 = arith.addf %34, %36 : vector<8x32xf32>
    %cst_27 = arith.constant 3.000000e+00 : f32
    %38 = vector.broadcast %cst_27 : f32 to vector<8x32xf32>
    %39 = arith.addf %37, %38 : vector<8x32xf32>
    %cst_28 = arith.constant 0.000000e+00 : f32
    %cst_29 = arith.constant 6.000000e+00 : f32
    %40 = vector.broadcast %cst_28 : f32 to vector<8x32xf32>
    %41 = arith.maximumf %40, %39 : vector<8x32xf32>
    %42 = vector.broadcast %cst_29 : f32 to vector<8x32xf32>
    %43 = arith.minimumf %42, %41 : vector<8x32xf32>
    %cst_30 = arith.constant 0.166666672 : f32
    %44 = vector.broadcast %cst_30 : f32 to vector<8x32xf32>
    %45 = arith.mulf %43, %44 : vector<8x32xf32>
    %46 = arith.mulf %37, %45 : vector<8x32xf32>
    %c0_31 = arith.constant 0 : index
    %c0_32 = arith.constant 0 : index
    %47 = vector.load %arg7[%c0_31, %c0_32] : memref<32x8xf32, #tpu.memory_space<vmem>>, vector<32x8xf32>
    %48 = vector.extract_strided_slice %46 {offsets = [0, 0], sizes = [8, 16], strides = [1, 1]} : vector<8x32xf32> to vector<8x16xf32>
    %cst_33 = arith.constant dense<0.000000e+00> : vector<32x16xf32>
    %49 = tpu.matmul %47, %48, %cst_33 {dimension_numbers = #tpu.dot_dimension_numbers<[1], [0], [0], [1], [0, 0, 1, 1], [], []>} : vector<32x8xf32>, vector<8x16xf32>, vector<32x16xf32> -> vector<32x16xf32>
    %cst_34 = arith.constant 5.000000e-01 : f32
    %50 = vector.broadcast %cst_34 : f32 to vector<32x16xf32>
    %51 = arith.mulf %50, %49 : vector<32x16xf32>
    %52 = math.tanh %51 : vector<32x16xf32>
    %cst_35 = arith.constant 5.000000e-01 : f32
    %53 = vector.broadcast %cst_35 : f32 to vector<32x16xf32>
    %54 = arith.mulf %53, %52 : vector<32x16xf32>
    %cst_36 = arith.constant 5.000000e-01 : f32
    %55 = vector.broadcast %cst_36 : f32 to vector<32x16xf32>
    %56 = arith.addf %54, %55 : vector<32x16xf32>
    %c0_37 = arith.constant 0 : index
    %c0_38 = arith.constant 0 : index
    %57 = vector.load %arg8[%c0_37, %c0_38] : memref<32x8xf32, #tpu.memory_space<vmem>>, vector<32x8xf32>
    %58 = vector.extract_strided_slice %46 {offsets = [0, 16], sizes = [8, 16], strides = [1, 1]} : vector<8x32xf32> to vector<8x16xf32>
    %cst_39 = arith.constant dense<0.000000e+00> : vector<32x16xf32>
    %59 = tpu.matmul %57, %58, %cst_39 {dimension_numbers = #tpu.dot_dimension_numbers<[1], [0], [0], [1], [0, 0, 1, 1], [], []>} : vector<32x8xf32>, vector<8x16xf32>, vector<32x16xf32> -> vector<32x16xf32>
    %cst_40 = arith.constant 5.000000e-01 : f32
    %60 = vector.broadcast %cst_40 : f32 to vector<32x16xf32>
    %61 = arith.mulf %60, %59 : vector<32x16xf32>
    %62 = math.tanh %61 : vector<32x16xf32>
    %cst_41 = arith.constant 5.000000e-01 : f32
    %63 = vector.broadcast %cst_41 : f32 to vector<32x16xf32>
    %64 = arith.mulf %63, %62 : vector<32x16xf32>
    %cst_42 = arith.constant 5.000000e-01 : f32
    %65 = vector.broadcast %cst_42 : f32 to vector<32x16xf32>
    %66 = arith.addf %64, %65 : vector<32x16xf32>
    %c0_43 = arith.constant 0 : index
    %c0_44 = arith.constant 0 : index
    %67 = vector.load %arg12[%c0_43, %c0_44] : memref<16x256xf32, #tpu.memory_space<vmem>>, vector<16x256xf32>
    %cst_45 = arith.constant dense<0.000000e+00> : vector<32x256xf32>
    %68 = tpu.matmul %56, %67, %cst_45 {dimension_numbers = #tpu.dot_dimension_numbers<[1], [0], [0], [1], [0, 0, 1, 1], [], []>} : vector<32x16xf32>, vector<16x256xf32>, vector<32x256xf32> -> vector<32x256xf32>
    %c0_46 = arith.constant 0 : index
    %c0_47 = arith.constant 0 : index
    %69 = vector.load %arg13[%c0_46, %c0_47] : memref<16x256xf32, #tpu.memory_space<vmem>>, vector<16x256xf32>
    %cst_48 = arith.constant dense<0.000000e+00> : vector<32x256xf32>
    %70 = tpu.matmul %66, %69, %cst_48 {dimension_numbers = #tpu.dot_dimension_numbers<[1], [0], [0], [1], [0, 0, 1, 1], [], []>} : vector<32x16xf32>, vector<16x256xf32>, vector<32x256xf32> -> vector<32x256xf32>
    %71 = arith.mulf %68, %70 : vector<32x256xf32>
    %72 = vector.shape_cast %71 : vector<32x256xf32> to vector<1x32x256xf32>
    %cst_49 = arith.constant dense<0xFF800000> : vector<1x256xf32>
    %73 = vector.multi_reduction <maximumf>, %0, %cst_49 [1] : vector<1x32x256xf32> to vector<1x256xf32>
    %c0_50 = arith.constant 0 : index
    %c0_51 = arith.constant 0 : index
    %74 = vector.load %arg16[%c0_50, %c0_51] : memref<1x32xf32, #tpu.memory_space<vmem>>, vector<1x32xf32>
    %cst_52 = arith.constant dense<0.000000e+00> : vector<1x256xf32>
    %75 = tpu.matmul %74, %1, %cst_52 {dimension_numbers = #tpu.dot_dimension_numbers<[1], [0], [0], [1], [0, 0, 1, 1], [], []>} : vector<1x32xf32>, vector<32x256xf32>, vector<1x256xf32> -> vector<1x256xf32>
    %c0_53 = arith.constant 0 : index
    %c0_54 = arith.constant 0 : index
    %76 = vector.load %arg14[%c0_53, %c0_54] : memref<256x256xf32, #tpu.memory_space<vmem>>, vector<256x256xf32>
    %cst_55 = arith.constant dense<0.000000e+00> : vector<1x256xf32>
    %77 = tpu.matmul %73, %76, %cst_55 {dimension_numbers = #tpu.dot_dimension_numbers<[1], [0], [0], [1], [0, 0, 1, 1], [], []>} : vector<1x256xf32>, vector<256x256xf32>, vector<1x256xf32> -> vector<1x256xf32>
    %c0_56 = arith.constant 0 : index
    %c0_57 = arith.constant 0 : index
    %78 = vector.load %arg15[%c0_56, %c0_57] : memref<256x256xf32, #tpu.memory_space<vmem>>, vector<256x256xf32>
    %cst_58 = arith.constant dense<0.000000e+00> : vector<1x256xf32>
    %79 = tpu.matmul %75, %78, %cst_58 {dimension_numbers = #tpu.dot_dimension_numbers<[1], [0], [0], [1], [0, 0, 1, 1], [], []>} : vector<1x256xf32>, vector<256x256xf32>, vector<1x256xf32> -> vector<1x256xf32>
    %80 = arith.addf %77, %79 : vector<1x256xf32>
    %cst_59 = arith.constant 5.000000e-01 : f32
    %81 = vector.broadcast %cst_59 : f32 to vector<1x256xf32>
    %82 = arith.mulf %81, %80 : vector<1x256xf32>
    %83 = math.tanh %82 : vector<1x256xf32>
    %cst_60 = arith.constant 5.000000e-01 : f32
    %84 = vector.broadcast %cst_60 : f32 to vector<1x256xf32>
    %85 = arith.mulf %84, %83 : vector<1x256xf32>
    %cst_61 = arith.constant 5.000000e-01 : f32
    %86 = vector.broadcast %cst_61 : f32 to vector<1x256xf32>
    %87 = arith.addf %85, %86 : vector<1x256xf32>
    %88 = arith.mulf %0, %72 : vector<1x32x256xf32>
    %89 = vector.shape_cast %87 : vector<1x256xf32> to vector<1x1x256xf32>
    %90 = vector.broadcast %89 : vector<1x1x256xf32> to vector<1x32x256xf32>
    %91 = arith.mulf %88, %90 : vector<1x32x256xf32>
    %c0_62 = arith.constant 0 : index
    %c0_63 = arith.constant 0 : index
    %c0_64 = arith.constant 0 : index
    %92 = vector.load %arg17[%c0_62, %c0_63, %c0_64] : memref<1x32x256xf32, #tpu.memory_space<vmem>>, vector<1x32x256xf32>
    tpu.vector_store %arg17[%c0_62, %c0_63, %c0_64], %91 {strides = array<i32>} : memref<1x32x256xf32, #tpu.memory_space<vmem>>, vector<1x32x256xf32>,
    return
  }
  func.func @transform_0(%arg0: i32) -> (i32, i32, i32) {
    %c0_i32 = arith.constant 0 : i32
    %c0_i32_0 = arith.constant 0 : i32
    %c0_i32_1 = arith.constant 0 : i32
    return %arg0, %c0_i32, %c0_i32_0 : i32, i32, i32
  }
  func.func @transform_1(%arg0: i32) -> (i32, i32, i32) {
    %c0_i32 = arith.constant 0 : i32
    %c0_i32_0 = arith.constant 0 : i32
    %c0_i32_1 = arith.constant 0 : i32
    return %arg0, %c0_i32, %c0_i32_0 : i32, i32, i32
  }
  func.func @transform_2(%arg0: i32) -> (i32, i32) {
    %c0_i32 = arith.constant 0 : i32
    %c0_i32_0 = arith.constant 0 : i32
    %c0_i32_1 = arith.constant 0 : i32
    return %c0_i32, %c0_i32_0 : i32, i32
  }
  func.func @transform_3(%arg0: i32) -> (i32, i32) {
    %c0_i32 = arith.constant 0 : i32
    %c0_i32_0 = arith.constant 0 : i32
    %c0_i32_1 = arith.constant 0 : i32
    return %c0_i32, %c0_i32_0 : i32, i32
  }
  func.func @transform_4(%arg0: i32) -> (i32, i32) {
    %c0_i32 = arith.constant 0 : i32
    %c0_i32_0 = arith.constant 0 : i32
    %c0_i32_1 = arith.constant 0 : i32
    return %c0_i32, %c0_i32_0 : i32, i32
  }
  func.func @transform_5(%arg0: i32) -> (i32, i32) {
    %c0_i32 = arith.constant 0 : i32
    %c0_i32_0 = arith.constant 0 : i32
    %c0_i32_1 = arith.constant 0 : i32
    return %c0_i32, %c0_i32_0 : i32, i32
  }
  func.func @transform_6(%arg0: i32) -> (i32, i32) {
    %c0_i32 = arith.constant 0 : i32
    %c0_i32_0 = arith.constant 0 : i32
    %c0_i32_1 = arith.constant 0 : i32
    return %c0_i32, %c0_i32_0 : i32, i32
  }
  func.func @transform_7(%arg0: i32) -> (i32, i32) {
    %c0_i32 = arith.constant 0 : i32
    %c0_i32_0 = arith.constant 0 : i32
    %c0_i32_1 = arith.constant 0 : i32
    return %c0_i32, %c0_i32_0 : i32, i32
  }
  func.func @transform_8(%arg0: i32) -> (i32, i32) {
    %c0_i32 = arith.constant 0 : i32
    %c0_i32_0 = arith.constant 0 : i32
    %c0_i32_1 = arith.constant 0 : i32
    return %c0_i32, %c0_i32_0 : i32, i32
  }
  func.func @transform_9(%arg0: i32) -> (i32, i32) {
    %c0_i32 = arith.constant 0 : i32
    %c0_i32_0 = arith.constant 0 : i32
    %c0_i32_1 = arith.constant 0 : i32
    return %c0_i32, %c0_i32_0 : i32, i32
  }
  func.func @transform_10(%arg0: i32) -> (i32, i32) {
    %c0_i32 = arith.constant 0 : i32
    %c0_i32_0 = arith.constant 0 : i32
    %c0_i32_1 = arith.constant 0 : i32
    return %c0_i32, %c0_i32_0 : i32, i32
  }
  func.func @transform_11(%arg0: i32) -> (i32, i32) {
    %c0_i32 = arith.constant 0 : i32
    %c0_i32_0 = arith.constant 0 : i32
    %c0_i32_1 = arith.constant 0 : i32
    return %c0_i32, %c0_i32_0 : i32, i32
  }
  func.func @transform_12(%arg0: i32) -> (i32, i32) {
    %c0_i32 = arith.constant 0 : i32
    %c0_i32_0 = arith.constant 0 : i32
    %c0_i32_1 = arith.constant 0 : i32
    return %c0_i32, %c0_i32_0 : i32, i32
  }
  func.func @transform_13(%arg0: i32) -> (i32, i32) {
    %c0_i32 = arith.constant 0 : i32
    %c0_i32_0 = arith.constant 0 : i32
    %c0_i32_1 = arith.constant 0 : i32
    return %c0_i32, %c0_i32_0 : i32, i32
  }
  func.func @transform_14(%arg0: i32) -> (i32, i32) {
    %c0_i32 = arith.constant 0 : i32
    %c0_i32_0 = arith.constant 0 : i32
    %c0_i32_1 = arith.constant 0 : i32
    return %c0_i32, %c0_i32_0 : i32, i32
  }
  func.func @transform_15(%arg0: i32) -> (i32, i32) {
    %c0_i32 = arith.constant 0 : i32
    %c0_i32_0 = arith.constant 0 : i32
    %c0_i32_1 = arith.constant 0 : i32
    return %c0_i32, %c0_i32_0 : i32, i32
  }
  func.func @transform_16(%arg0: i32) -> (i32, i32, i32) {
    %c0_i32 = arith.constant 0 : i32
    %c0_i32_0 = arith.constant 0 : i32
    %c0_i32_1 = arith.constant 0 : i32
    return %arg0, %c0_i32, %c0_i32_0 : i32, i32, i32
  }
}

</mosaic_0001>

<bundles_post_ra>
// kernel: tpu_custom_call.1
= control target key start
LH: loop header
LB: loop body
LE: loop exit
PB: predicated region body
PF: predicated region fallthrough
CT: control target
= control target key end

     0   :  { %s4554_s0 = inlined_call_operand.hbm [shape: f32[2,32,256], index: 0, kind: input, shape index: {}]   ;;  %s4555_s1 = inlined_call_operand.hbm [shape: f32[2,32,256], index: 1, kind: input, shape index: {}]   ;;  %s4556_s2 = inlined_call_operand.hbm [shape: f32[8,32], index: 2, kind: input, shape index: {}]   ;;  %s4557_s3 = inlined_call_operand.hbm [shape: f32[8,32], index: 3, kind: input, shape index: {}]   ;;  %s4558_s4 = inlined_call_operand.vmem [shape: f32[8,1], index: 4, kind: input, shape index: {}]   ;;  %s4559_s5 = inlined_call_operand.vmem [shape: f32[8,1], index: 5, kind: input, shape index: {}]   ;;  %s4560_s6 = inlined_call_operand.vmem [shape: f32[32,8], index: 6, kind: input, shape index: {}]   ;;  %s4561_s7 = inlined_call_operand.vmem [shape: f32[32,8], index: 7, kind: input, shape index: {}]   ;;  %s4562_s8 = inlined_call_operand.vmem [shape: f32[256,32], index: 8, kind: input, shape index: {}]   ;;  %s4563_s9 = inlined_call_operand.vmem [shape: f32[256,32], index: 9, kind: input, shape index: {}]   ;;  %s4564_s10 = inlined_call_operand.vmem [shape: f32[256,32], index: 10, kind: input, shape index: {}]   ;;  %s4565_s11 = inlined_call_operand.vmem [shape: f32[16,256], index: 11, kind: input, shape index: {}]   ;;  %s4566_s12 = inlined_call_operand.hbm [shape: f32[16,256], index: 12, kind: input, shape index: {}]   ;;  %s4567_s13 = inlined_call_operand.vmem [shape: f32[256,256], index: 13, kind: input, shape index: {}]   ;;  %s4568_s14 = inlined_call_operand.vmem [shape: f32[256,256], index: 14, kind: input, shape index: {}]   ;;  %s4569_s15 = inlined_call_operand.vmem [shape: f32[1,32], index: 15, kind: input, shape index: {}]   ;;  %s4570_s16 = inlined_call_operand.hbm [shape: f32[2,32,256], index: 16, kind: output, shape index: {}]  }
   0x1   :  { %4591 = sst [smem:[#allocation23_spill]] %s4554_s0 }
   0x2   :  { %4592 = sst [smem:[#allocation24_spill]] %s4556_s2 }
   0x3   :  { %4593 = sst [smem:[#allocation25_spill]] %s4557_s3 }
   0x4   :  { %4594 = sst [smem:[#allocation26_spill]] %s4565_s11 }
   0x5   :  { %4595 = sst [smem:[#allocation27_spill]] %s4566_s12 }
   0x6   :  { %4596 = sst [smem:[#allocation28_spill]] %s4567_s13 }
   0x7   :  { %4597 = sst [smem:[#allocation29_spill]] %s4568_s14 }
   0x8   :  { %4598 = sst [smem:[#allocation30_spill]] %s4569_s15 }
   0x9   :  { %4599 = sst [smem:[#allocation31_spill]] %s4570_s16 }
   0xa   :  { %21 = vsyncpa [#allocation3], 0 }
   0xb   :  { %23 = vsyncpa [#allocation3 + $0x1], 0 }
   0xc   :  { %24 = vsyncpa [#allocation6], 0 }
   0xd   :  { %26 = vsyncpa [#allocation6 + $0x1], 0 }
   0xe   :  { %27 = vsyncpa [#allocation9], 0 }
   0xf   :  { %28 = vsyncpa [#allocation4], 0 }
  0x10   :  { %30 = vsyncpa [#allocation4 + $0x1], 0  ;;  %s3149_s21 = smov 0   ;;  %s3151_s22 = smov 0  }
  0x11   :  { %s3153_s23 = smov 0   ;;  %s3155_s24 = smov 0  }
  0x12 LB: > { %4600 = sst [smem:[#allocation17_spill]] %s3034_s21  ;;  %s3170_s25 = sadd.s32 4294967295, %s3046_s24   ;;  %s3046_s24 = sphi %s3155_s24, %s4637_s24   ;;  %s3042_s23 = sphi %s3153_s23, %s4639_s23   ;;  %s3038_s22 = sphi %s3151_s22, %s4641_s22   ;;  %s3034_s21 = sphi %s3149_s21, %s4640_s21  }
  0x13   : > { %4601 = sst [smem:[#allocation18_spill]] %s3042_s23  ;;  %s2358_s26 = sadd.s32 4294967294, %s3046_s24  }
  0x14   : > { %p56_p0 = scmp.ne.s32.totalorder %s3038_s22, %s3034_s21  ;;  %p4573_p1 = scmp.eq.s32.totalorder %s3170_s25, 0 }
  0x15   : > { %p406_p3 = scmp.eq.s32.totalorder %s2358_s26, 1  ;;  %p2359_p5 = scmp.ge.s32.totalorder %s3046_s24, 1 }
  0x16   : > { %p3179_p4 = por %p4573_p1, %p56_p0  ;;  %p413_p7 = scmp.lt.s32.totalorder %s3046_s24, 3 }
  0x17   : > { %p3184_p6 = por %p406_p3, %p56_p0  ;;  %s3048_s30 = smov [#allocation7]  }
  0x18   : > { %s4602_s27 = scalar_select %p3179_p4, 1, 0 }
  0x19   : > { %s4603_s28 = scalar_select %p3184_p6, 1, 0 }
  0x1a   : > { %p3189_p8 = pnand %p2359_p5, %p413_p7  ;;  %s426_s0 = sshll.u32 %s3048_s30, 4  ;;  %s427_s0 = int_to_ptr.vmem [resolvable:$true] %s426_s0 }
  0x1b   : > { %4604 = sst [smem:[#allocation19_spill]] %s4603_s28  ;;  %s3049_s17 = smov [#allocation8]  }
  0x1c   : > { %s4605_s29 = scalar_select %p3189_p8, 1, 0 }
  0x1d   : > { %p2612_p10 = pneg %p3189_p8  ;;  %s437_s18 = sshll.u32 %s3049_s17, 4  ;;  %s438_s18 = int_to_ptr.vmem [resolvable:$true] %s437_s18 }
  0x1e   : > { %s3050_s20 = smov [#allocation10]   ;;  %s2847_s30 = scalar_lea.vmem %s427_s0, 128 }
  0x1f   : > { %p3198_p11 = pnand %p2612_p10, %p4573_p1  ;;  %s471_s26 = sshll.u32 %s3050_s20, 4  ;;  %s3202_s26 = int_to_ptr.vmem [resolvable:$true] %s471_s26 }
  0x20   : > { %p2848_p13 = scmp.ne.s32.totalorder %s427_s0, %s2847_s30  ;;  %p2855_p5 = scmp.lt.s32.totalorder %s427_s0, %s427_s0 }
  0x21   : > { %p2838_p12 = pneg %p3198_p11  ;;  %p2856_p7 = scmp.lt.s32.totalorder %s2847_s30, %s2847_s30 }
  0x23   : > { %p2850_p0 = pnand %p2848_p13, %p2838_p12  ;;  %p2857_p10 = por %p2856_p7, %p2855_p5 }
  0x25   : > { %p2851_p3 = pneg %p2850_p0 }
  0x27   : > { %p2858_p9 = pnand %p2857_p10, %p2851_p3 }
  0x29   : > { %2861 = shalt.err (!%p2858_p9)
}
  0x2a   : > { %s4607_s2 = sld [smem:[#allocation24_spill]]  ;;  %s2873_s20 = scalar_lea.vmem %s438_s18, 128 }
  0x2b   : > { %p2874_p1 = scmp.ne.s32.totalorder %s438_s18, %s2873_s20  ;;  %p2881_p13 = scmp.lt.s32.totalorder %s438_s18, %s438_s18 }
  0x2c   : > { %p2882_p0 = scmp.lt.s32.totalorder %s2873_s20, %s2873_s20 }
  0x2d   : > { %p2876_p2 = pnand %p2874_p1, %p2838_p12 }
  0x2e   : > { %p2883_p4 = por %p2882_p0, %p2881_p13 }
  0x2f   : > { %p2877_p6 = pneg %p2876_p2 }
  0x30   : > { %2615 = dma.hbm_to_vmem [thread:$0]  (!%p3198_p11), %s4607_s2, 128, %s427_s0, [#allocation6]  }
  0x31   : > { %p2884_p8 = pnand %p2883_p4, %p2877_p6 }
  0x33   : > { %2887 = shalt.err (!%p2884_p8)
}
  0x34   : > { %s4608_s3 = sld [smem:[#allocation25_spill]]  ;;  %s2899_s28 = scalar_lea.vmem %s3202_s26, 512 }
  0x35   : > { %p2900_p9 = scmp.ne.s32.totalorder %s3202_s26, %s2899_s28  ;;  %p2907_p3 = scmp.lt.s32.totalorder %s3202_s26, %s3202_s26 }
  0x36   : > { %p2908_p4 = scmp.lt.s32.totalorder %s2899_s28, %s2899_s28 }
  0x37   : > { %p2902_p1 = pnand %p2900_p9, %p2838_p12 }
  0x38   : > { %p2909_p6 = por %p2908_p4, %p2907_p3 }
  0x39   : > { %p2903_p2 = pneg %p2902_p1 }
  0x3a   : > { %2618 = dma.hbm_to_vmem [thread:$0]  (!%p3198_p11), %s4608_s3, 128, %s438_s18, [#allocation9]  }
  0x3b   : > { %p2910_p8 = pnand %p2909_p6, %p2903_p2 }
  0x3d   : > { %2913 = shalt.err (!%p2910_p8)
}
  0x3e   : > { %s4577_s0 = smov 256   ;;  %s4579_s21 = smov 16  }
  0x3f   : > { %s4609_s12 = sld [smem:[#allocation27_spill]]  ;;  %s3239_s20 = sadd.s32 1, %s3046_s24  }
  0x40   : > { %4610 = sst [smem:[#allocation20_spill]] %s3239_s20  ;;  %s40_s30 = ssub.s32 %s3046_s24, %s3239_s20 }
  0x41   : > { %s43_s28 = sadd.s32 1, %s3042_s23  ;;  %p41_p12 = scmp.eq.s32.totalorder %s40_s30, 0 }
  0x42   : > { %p50_p5 = scmp.ne.s32.totalorder %s3042_s23, %s3038_s22  ;;  %p51_p7 = scmp.eq.s32.totalorder %s3046_s24, 0 }
  0x43   : > { %p2636_p10 = scmp.lt.s32.totalorder %s3046_s24, 2  ;;  %p4612_p0 = scmp.eq.s32.totalorder %s3170_s25, 1 }
  0x44   : > { %s3249_s2 = scalar_select %p41_p12, %s3042_s23, %s43_s28  }
  0x45   : > { %2621 = dma.hbm_to_vmem [thread:$0]  (!%p3198_p11), %s4609_s12, 512, %s3202_s26, [#allocation9], %s4577_s0, %s4577_s0, %s4579_s21  }
  0x46   : > { %4611 = sst [smem:[#allocation21_spill]] %s3249_s2  ;;  %p52_p13 = por %p51_p7, %p50_p5 }
  0x47   : > { %p3253_p9 = por %p4612_p0, %p50_p5  ;;  %s494_s3 = sand.u32 1, %s3042_s23  }
  0x48   : > { %s2401_s18 = sshll.u32 %s3046_s24, 10  ;;  %s3259_s26 = sshll.u32 %s494_s3, 6 }
  0x49   : > { %s4613_s19 = scalar_select %p3253_p9, 1, 0 }
  0x4a   : > { %s4615_s21 = sld [smem:[#allocation23_spill]]  ;;  %s498_s28 = scalar_lea.vmem [#allocation2], %s3259_s26 }
  0x4b   : > { %4614 = sst [smem:[#allocation22_spill]] %s4613_s19  ;;  %s505_s2 = sshll.u32 %s498_s28, 4  ;;  %s3271_s2 = int_to_ptr.vmem [resolvable:$true] %s505_s2 }
  0x4c   : > { %p3267_p11 = pnand %p2636_p10, %p52_p13  ;;  %s3276_s0 = scalar_lea.hbm %s4555_s1, %s2401_s18 }
  0x4e   : > { %p2916_p2 = pneg %p3267_p11 }
  0x50   : > { %s4616_s12 = smov %s4615_s21  ;;  %s3264_s30 = scalar_lea.hbm %s4615_s21, %s2401_s18 }
  0x51   : > { %s3278_s21 = scalar_lea.sflag [#allocation3], %s494_s3  ;;  %s2914_s17 = scalar_lea.hbm %s3264_s30, 1024 }
  0x52   : > { %p2915_p1 = scmp.ne.s32.totalorder %s3264_s30, %s2914_s17  ;;  %s2919_s15 = scalar_lea.hbm %s4616_s12, 2048 }
  0x53   : > { %p2920_p6 = scmp.lt.s32.totalorder %s3264_s30, %s4616_s12  ;;  %p2921_p8 = scmp.lt.s32.totalorder %s2919_s15, %s2914_s17 }
  0x54   : > { %p2917_p3 = pnand %p2916_p2, %p2915_p1 }
  0x55   : > { %p2922_p12 = por %p2921_p8, %p2920_p6 }
  0x56   : > { %p2918_p4 = pneg %p2917_p3 }
  0x58   : > { %p2923_p5 = pnand %p2922_p12, %p2918_p4 }
  0x5a   : > { %2926 = shalt.err (!%p2923_p5)
}
  0x5b   : > { %s2927_s3 = scalar_lea.vmem %s3271_s2, 1024  ;;  %s3053_s16 = smov [#allocation2]  }
  0x5c   : > { %p2928_p7 = scmp.ne.s32.totalorder %s3271_s2, %s2927_s3  ;;  %s2932_s23 = sshll.u32 %s3053_s16, 4  ;;  %s2933_s23 = int_to_ptr.vmem [resolvable:$false] %s2932_s23 }
  0x5d   : > { %s2934_s19 = scalar_lea.vmem %s2933_s23, 2048  ;;  %p2935_p0 = scmp.lt.s32.totalorder %s3271_s2, %s2933_s23 }
  0x5e   : > { %p2930_p10 = pnand %p2928_p7, %p2916_p2  ;;  %p2936_p1 = scmp.lt.s32.totalorder %s2934_s19, %s2927_s3 }
  0x60   : > { %p2931_p13 = pneg %p2930_p10  ;;  %p2937_p3 = por %p2936_p1, %p2935_p0 }
  0x62   : > { %p2938_p6 = pnand %p2937_p3, %p2931_p13 }
  0x64   : > { %2941 = shalt.err (!%p2938_p6)
}
  0x65   : > { %s4618_s13 = smov 16   ;;  %s4619_s14 = smov 256  }
  0x66   : > { %2625 = dma.hbm_to_vmem [thread:$0]  (!%p3267_p11), %s3264_s30, 1024, %s3271_s2, %s3278_s21, %s4619_s14, %s4619_s14, %s4618_s13  }
  0x67   : > { %s519_s15 = scalar_lea.vmem [#allocation5], %s3259_s26  ;;  %s515_s17 = sand.u32 1, %s3046_s24  }
  0x68   : > { %s526_s18 = sshll.u32 %s519_s15, 4  ;;  %s516_s28 = scalar_lea.sflag [#allocation6], %s515_s17  ;;  %s3310_s18 = int_to_ptr.vmem [resolvable:$true] %s526_s18 }
  0x69   : > { %s2942_s3 = scalar_lea.hbm %s3276_s0, 1024  ;;  %s2947_s19 = scalar_lea.hbm %s4555_s1, 2048 }
  0x6a   : > { %p2943_p4 = scmp.ne.s32.totalorder %s3276_s0, %s2942_s3  ;;  %p2948_p5 = scmp.lt.s32.totalorder %s3276_s0, %s4555_s1 }
  0x6b   : > { %p2949_p7 = scmp.lt.s32.totalorder %s2947_s19, %s2942_s3 }
  0x6c   : > { %p2945_p8 = pnand %p2943_p4, %p2916_p2 }
  0x6d   : > { %p2950_p10 = por %p2949_p7, %p2948_p5 }
  0x6e   : > { %p2946_p12 = pneg %p2945_p8 }
  0x70   : > { %p2951_p13 = pnand %p2950_p10, %p2946_p12 }
  0x72   : > { %2954 = shalt.err (!%p2951_p13)
}
  0x73   : > { %s2955_s2 = scalar_lea.vmem %s3310_s18, 1024  ;;  %s3054_s26 = smov [#allocation5]  }
  0x74   : > { %p2956_p0 = scmp.ne.s32.totalorder %s3310_s18, %s2955_s2  ;;  %s2960_s30 = sshll.u32 %s3054_s26, 4  ;;  %s2961_s30 = int_to_ptr.vmem [resolvable:$false] %s2960_s30 }
  0x75   : > { %s2962_s21 = scalar_lea.vmem %s2961_s30, 2048  ;;  %p2963_p6 = scmp.lt.s32.totalorder %s3310_s18, %s2961_s30 }
  0x76   : > { %p2958_p1 = pnand %p2956_p0, %p2916_p2  ;;  %p2964_p4 = scmp.lt.s32.totalorder %s2962_s21, %s2955_s2 }
  0x78   : > { %p2959_p3 = pneg %p2958_p1  ;;  %p2965_p8 = por %p2964_p4, %p2963_p6 }
  0x7a   : > { %p2966_p5 = pnand %p2965_p8, %p2959_p3 }
  0x7c   : > { %2969 = shalt.err (!%p2966_p5)
}
  0x7d   : > { %2628 = dma.hbm_to_vmem [thread:$0]  (!%p3267_p11), %s3276_s0, 1024, %s3310_s18, %s516_s28, %s4619_s14, %s4619_s14, %s4618_s13  }
  0x7e   : > { %p4620_p2 = scmp.ne.s32.totalorder %s4605_s29, 0 }
  0x7f   : > { %s3340_s11 = sand.u32 (!%p4620_p2), 1, %s3038_s22   ;;  %p4621_p12 = scmp.ne.s32.totalorder (!%p4620_p2), %s4602_s27, 0 }
  0x80   : > { %538 = sbr.rel (%p4620_p2) target bundleno = 1613 (0x64d), region = 84  ;;  %s3343_s12 = sshll.u32 (!%p4620_p2), %s3340_s11, 6 }
  0x81   : > { %s541_s15 = scalar_lea.sflag (!%p4620_p2), [#allocation3], %s3340_s11  ;;  %s3347_s20 = scalar_lea.vmem (!%p4620_p2), [#allocation2], %s3343_s12 }
  0x85   : > { %3013 = dma.done.wait (%p4621_p12), %s541_s15, 1024  }
  0x86   : > { %3015 = vsyncadd (%p4621_p12), %s541_s15, 4294966272  ;;  %s549_s29 = sand.u32 1, %s3170_s25   ;;  %s3355_s13 = scalar_lea.vmem [#allocation5], %s3343_s12 }
  0x87   : > { %s550_s0 = scalar_lea.sflag [#allocation6], %s549_s29 }
  0x88   : > { %3017 = dma.done.wait (%p4621_p12), %s550_s0, 1024  }
  0x89   : > { %3019 = vsyncadd (%p4621_p12), %s550_s0, 4294966272  ;;  %p4622_p11 = scmp.eq.s32.totalorder %s3170_s25, 0 }
  0x8b   : > { %3021 = dma.done.wait (%p4622_p11), [#allocation6], 128   ;;  %p4623_p7 = pmov %p4622_p11 }
  0x8d   : > { %3023 = vsyncadd (%p4623_p7), [#allocation6], 4294967168  ;;  %p4624_p10 = pmov %p4623_p7 }
  0x8e   : > { %p4625_p13 = pmov %p4623_p7 }
  0x8f   : > { %3025 = dma.done.wait (%p4624_p10), [#allocation9], 640  }
  0x90   : > { %3027 = vsyncadd (%p4625_p13), [#allocation9], 4294966656  ;;  %v627_v0 = vld [vmem:[%s3355_s13] sm:$0xff]  ;;  %v628_v1 = vld [vmem:[%s3355_s13 + $0x8] sm:$0xff]  ;;  %s3055_s27 = smov 16   ;;  %v768_v24 = vlaneseq  ;;  %s3056_s14 = smov 32  }
  0x91   : > { %v629_v2 = vld [vmem:[%s3355_s13 + $0x10] sm:$0xff]  ;;  %v2686_v3 = vpack.i.bf16 %v628_v1, %v627_v0  ;;  %v630_v4 = vld [vmem:[%s3355_s13 + $0x18] sm:$0xff]  ;;  %v3374_v5 = vld [vmem:[%s3347_s20] sm:$0xff]  ;;  %s3057_s17 = smov 64   ;;  %vm3059_vm3 = vmmov 0   ;;  %vm1193_vm4 = vcmask 261120  }
  0x92   : > { %v620_v6 = vld [vmem:[%s3347_s20 + $0x8] sm:$0xff]  ;;  %v2696_v7 = vpack.i.bf16 %v630_v4, %v629_v2  ;;  %v3378_v8 = vld [vmem:[%s3347_s20 + $0x10] sm:$0xff]  ;;  %v3381_v9 = vld [vmem:[%s3347_s20 + $0x18] sm:$0xff]  ;;  %v3427_v25 = vand.u32 127, %v768_v24  ;;  %vm1363_vm5 = vcmask 64512   ;;  %s3061_s30 = smov 112  }
  0x93   : > { %731 = vmatprep.mubr.f32.mxu0 %v620_v6  ;;  %2687 = vrot.lane.b32.xlu0 %v2686_v3, %s3055_s27  ;;  %v2691_v10 = vpack.i.bf16 %v620_v6, %v3374_v5  ;;  %v2701_v11 = vpack.i.bf16 %v3381_v9, %v3378_v8  ;;  %v3389_v12 = vld [vmem:[%s3355_s13 + $0x20] sm:$0xff]  ;;  %v3392_v13 = vld [vmem:[%s3355_s13 + $0x28] sm:$0xff]  ;;  %v3407_v18 = vld [vmem:[%s3355_s13 + $0x30] sm:$0xff]  ;;  %vm1602_vm6 = vcmask 130048   ;;  %s4627_s28 = sld [smem:[#allocation29_spill]]  ;;  %s2403_s21 = sshll.u32 %s3170_s25, 10 }
  0x94   : > { %2697 = vrot.lane.b32.xlu1 %v2696_v7, %s3055_s27  ;;  %v3395_v14 = vld [vmem:[%s3347_s20 + $0x20] sm:$0xff]  ;;  %v3398_v15 = vld [vmem:[%s3347_s20 + $0x28] sm:$0xff]  ;;  %v2706_v16 = vpack.i.bf16 %v3392_v13, %v3389_v12  ;;  %v3410_v19 = vld [vmem:[%s3355_s13 + $0x38] sm:$0xff]  ;;  %vm770_vm0 = vcmp.lt.s32.totalorder %v3427_v25, 16  ;;  %vm803_vm1 = vcmp.lt.s32.totalorder %v3427_v25, 32  ;;  %vm836_vm2 = vcmp.lt.s32.totalorder %v3427_v25, 64 }
  0x95   : > { %v2711_v17 = vpack.i.bf16 %v3398_v15, %v3395_v14  ;;  %v3413_v20 = vld [vmem:[%s3347_s20 + $0x30] sm:$0xff]  ;;  %v3416_v21 = vld [vmem:[%s3347_s20 + $0x38] sm:$0xff]  ;;  %v2716_v22 = vpack.i.bf16 %v3410_v19, %v3407_v18  ;;  %v1191_v25 = vld [vmem:[#allocation7] sm:$0xff]  ;;  %s4628_s23 = sld [smem:[#allocation28_spill]]  ;;  %s618_s15 = scalar_lea.vmem [#allocation11], %s3343_s12 }
  0x96   : > { %v2721_v23 = vpack.i.bf16 %v3416_v21, %v3413_v20  ;;  %s4632_s13 = sld [smem:[#allocation31_spill]]  ;;  %s2221_s12 = scalar_lea.sflag [#allocation4], %s3340_s11 }
  0x97   : > { %2692 = vrot.lane.b32.xlu0 %v2691_v10, %s3055_s27  ;;  %s3062_s3 = smov [#allocation11]  }
  0x98   : > { %2702 = vrot.lane.b32.xlu1 %v2701_v11, %s3055_s27  ;;  %s2974_s16 = sshll.u32 %s3062_s3, 4  ;;  %s2975_s16 = int_to_ptr.vmem [resolvable:$false] %s2974_s16 }
  0x9b   : > { %2707 = vrot.lane.b32.xlu0 %v2706_v16, %s3055_s27  ;;  %s4629_s19 = smov %s4628_s23 }
  0x9c   : > { %2712 = vrot.lane.b32.xlu1 %v2711_v17, %s3055_s27  ;;  %s4508_s18 = scalar_lea.hbm %s4632_s13, %s2403_s21 }
  0x9f   : > { %2717 = vrot.lane.b32.xlu0 %v2716_v22, %s3055_s27 }
  0xa0   : > { %2722 = vrot.lane.b32.xlu1 %v2721_v23, %s3055_s27 }
 0x105   : > { %v2688_v26 = vpop.permute.xlu0 %2687 }
 0x106   : > { %v2690_v27 = vunpack.i.h.bf16 %v2688_v26  ;;  %v2689_v28 = vunpack.i.l.bf16 %v2688_v26  ;;  %v2698_v29 = vpop.permute.xlu1 %2697 }
 0x107   : > { %v2700_v30 = vunpack.i.h.bf16 %v2698_v29  ;;  %v2699_v31 = vunpack.i.l.bf16 %v2698_v29 }
 0x108   : > { %v771_v32 = vsel %vm770_vm0, %v2689_v28, %v2690_v27  ;;  %v775_v33 = vsel %vm770_vm0, %v2690_v27, %v2689_v28 }
 0x109   : > { %v772_v34 = vsel %vm770_vm0, %v2699_v31, %v2700_v30  ;;  %v776_v35 = vsel %vm770_vm0, %v2700_v30, %v2699_v31  ;;  %v2693_v36 = vpop.permute.xlu0 %2692  ;;  %v3438_v37 = vmax.f32 %v627_v0, %v775_v33  ;;  %v3440_v38 = vmax.f32 %v628_v1, %v771_v32 }
 0x10a   : > { %v2695_v39 = vunpack.i.h.bf16 %v2693_v36  ;;  %v2694_v40 = vunpack.i.l.bf16 %v2693_v36  ;;  %v2703_v41 = vpop.permute.xlu1 %2702  ;;  %v3442_v42 = vmax.f32 %v629_v2, %v776_v35  ;;  %v3444_v43 = vmax.f32 %v630_v4, %v772_v34  ;;  %v650_v36 = vld [vmem:[%s4562_s8 + $0x78] sm:$0xff] }
 0x10b   : > { %v2705_v44 = vunpack.i.h.bf16 %v2703_v41  ;;  %v2704_v45 = vunpack.i.l.bf16 %v2703_v41  ;;  %v2726_v46 = vpack.i.bf16 %v3440_v38, %v3438_v37  ;;  %v664_v41 = vld [vmem:[%s4562_s8 + $0xe8] sm:$0xff] }
 0x10c   : > { %v873_v47 = vsel %vm770_vm0, %v2694_v40, %v2695_v39  ;;  %v877_v48 = vsel %vm770_vm0, %v2695_v39, %v2694_v40  ;;  %v2736_v49 = vpack.i.bf16 %v3444_v43, %v3442_v42  ;;  %v665_v39 = vld [vmem:[%s4562_s8 + $0xf0] sm:$0xff] }
 0x10d   : > { %v874_v50 = vsel %vm770_vm0, %v2704_v45, %v2705_v44  ;;  %v878_v51 = vsel %vm770_vm0, %v2705_v44, %v2704_v45  ;;  %2727 = vrot.lane.b32.xlu0 %v2726_v46, %s3056_s14  ;;  %v2708_v52 = vpop.permute.xlu0 %2707  ;;  %v3460_v53 = vmax.f32 %v3374_v5, %v877_v48  ;;  %v3462_v54 = vmax.f32 %v620_v6, %v873_v47  ;;  %v649_v40 = vld [vmem:[%s4562_s8 + $0x70] sm:$0xff]  ;;  %v648_v44 = vld [vmem:[%s4562_s8 + $0x68] sm:$0xff]  ;;  %v663_v45 = vld [vmem:[%s4562_s8 + $0xe0] sm:$0xff] }
 0x10e   : > { %v2710_v55 = vunpack.i.h.bf16 %v2708_v52  ;;  %v2709_v56 = vunpack.i.l.bf16 %v2708_v52  ;;  %v2713_v57 = vpop.permute.xlu1 %2712  ;;  %v3465_v58 = vmax.f32 %v3378_v8, %v878_v51  ;;  %v3468_v59 = vmax.f32 %v3381_v9, %v874_v50  ;;  %v647_v46 = vld [vmem:[%s4562_s8 + $0x60] sm:$0xff]  ;;  %v662_v47 = vld [vmem:[%s4562_s8 + $0xd8] sm:$0xff]  ;;  %v645_v50 = vld [vmem:[%s4562_s8 + $0x50] sm:$0xff] }
 0x10f   : > { %v2715_v60 = vunpack.i.h.bf16 %v2713_v57  ;;  %v2714_v61 = vunpack.i.l.bf16 %v2713_v57  ;;  %v2731_v62 = vpack.i.bf16 %v3462_v54, %v3460_v53  ;;  %v646_v48 = vld [vmem:[%s4562_s8 + $0x58] sm:$0xff]  ;;  %v660_v51 = vld [vmem:[%s4562_s8 + $0xc8] sm:$0xff] }
 0x110   : > { %v773_v63 = vsel %vm770_vm0, %v2709_v56, %v2710_v55  ;;  %v777_v0 = vsel %vm770_vm0, %v2710_v55, %v2709_v56  ;;  %v2741_v1 = vpack.i.bf16 %v3468_v59, %v3465_v58  ;;  %v644_v52 = vld [vmem:[%s4562_s8 + $0x48] sm:$0xff]  ;;  %v659_v55 = vld [vmem:[%s4562_s8 + $0xc0] sm:$0xff]  ;;  %v1020_v56 = vld [vmem:[%s4564_s10 + $0xf8] sm:$0xff] }
 0x111   : > { %v875_v2 = vsel %vm770_vm0, %v2714_v61, %v2715_v60  ;;  %v879_v3 = vsel %vm770_vm0, %v2715_v60, %v2714_v61  ;;  %2737 = vrot.lane.b32.xlu0 %v2736_v49, %s3056_s14  ;;  %v2718_v4 = vpop.permute.xlu0 %2717  ;;  %2732 = vrot.lane.b32.xlu1 %v2731_v62, %s3056_s14  ;;  %v3485_v6 = vmax.f32 %v3389_v12, %v777_v0  ;;  %v661_v49 = vld [vmem:[%s4562_s8 + $0xd0] sm:$0xff]  ;;  %v1004_v57 = vld [vmem:[%s4564_s10 + $0x78] sm:$0xff] }
 0x112   : > { %v2720_v7 = vunpack.i.h.bf16 %v2718_v4  ;;  %v2719_v10 = vunpack.i.l.bf16 %v2718_v4  ;;  %v2723_v11 = vpop.permute.xlu1 %2722  ;;  %v3488_v16 = vmax.f32 %v3392_v13, %v773_v63  ;;  %v3491_v17 = vmax.f32 %v3395_v14, %v879_v3  ;;  %v643_v60 = vld [vmem:[%s4562_s8 + $0x40] sm:$0xff]  ;;  %2448 = vmatprep.subr.mxu1 %v1020_v56  ;;  %v1019_v61 = vld [vmem:[%s4564_s10 + $0xf0] sm:$0xff]  ;;  %v658_v62 = vld [vmem:[%s4562_s8 + $0xb8] sm:$0xff] }
 0x113   : > { %v2725_v22 = vunpack.i.h.bf16 %v2723_v11  ;;  %v2724_v23 = vunpack.i.l.bf16 %v2723_v11  ;;  %v3494_v26 = vmax.f32 %v3398_v15, %v875_v2  ;;  %2449 = vmatpush3.msra.mxu1 %v1004_v57  ;;  %v1003_v63 = vld [vmem:[%s4564_s10 + $0x70] sm:$0xff]  ;;  %v1018_v0 = vld [vmem:[%s4564_s10 + $0xe8] sm:$0xff]  ;;  %v1017_v4 = vld [vmem:[%s4564_s10 + $0xe0] sm:$0xff] }
 0x114   : > { %v774_v27 = vsel %vm770_vm0, %v2719_v10, %v2720_v7  ;;  %v778_v12 = vsel %vm770_vm0, %v2720_v7, %v2719_v10  ;;  %v2746_v28 = vpack.i.bf16 %v3488_v16, %v3485_v6  ;;  %2450 = vmatprep.subr.mxu1 %v1019_v61  ;;  %v1002_v2 = vld [vmem:[%s4564_s10 + $0x68] sm:$0xff]  ;;  %v657_v3 = vld [vmem:[%s4562_s8 + $0xb0] sm:$0xff]  ;;  %v1001_v10 = vld [vmem:[%s4564_s10 + $0x60] sm:$0xff] }
 0x115   : > { %v876_v13 = vsel %vm770_vm0, %v2724_v23, %v2725_v22  ;;  %v880_v29 = vsel %vm770_vm0, %v2725_v22, %v2724_v23  ;;  %2742 = vrot.lane.b32.xlu1 %v2741_v1, %s3056_s14  ;;  %v3508_v30 = vmax.f32 %v3407_v18, %v778_v12  ;;  %v3511_v31 = vmax.f32 %v3410_v19, %v774_v27  ;;  %v666_v19 = vld [vmem:[%s4562_s8 + $0xf8] sm:$0xff]  ;;  %v641_v7 = vld [vmem:[%s4562_s8 + $0x30] sm:$0xff]  ;;  %v656_v11 = vld [vmem:[%s4562_s8 + $0xa8] sm:$0xff] }
 0x116   : > { %2747 = vrot.lane.b32.xlu0 %v2746_v28, %s3056_s14  ;;  %v2751_v32 = vpack.i.bf16 %v3494_v26, %v3491_v17  ;;  %v3517_v33 = vmax.f32 %v3413_v20, %v880_v29  ;;  %v3520_v34 = vmax.f32 %v3416_v21, %v876_v13  ;;  %2404 = vmatprep.subr.mxu0 %v666_v19  ;;  %v642_v1 = vld [vmem:[%s4562_s8 + $0x38] sm:$0xff]  ;;  %v640_v23 = vld [vmem:[%s4562_s8 + $0x28] sm:$0xff]  ;;  %v655_v12 = vld [vmem:[%s4562_s8 + $0xa0] sm:$0xff] }
 0x117   : > { %v2756_v35 = vpack.i.bf16 %v3511_v31, %v3508_v30  ;;  %2405 = vmatpush3.msra.mxu0 %v650_v36  ;;  %2451 = vmatpush3.msra.mxu1 %v1003_v63  ;;  %v1016_v22 = vld [vmem:[%s4564_s10 + $0xd8] sm:$0xff]  ;;  %v1015_v28 = vld [vmem:[%s4564_s10 + $0xd0] sm:$0xff]  ;;  %v639_v13 = vld [vmem:[%s4562_s8 + $0x20] sm:$0xff] }
 0x118   : > { %v2761_v18 = vpack.i.bf16 %v3520_v34, %v3517_v33  ;;  %2406 = vmatprep.subr.mxu0 %v665_v39  ;;  %2452 = vmatprep.subr.mxu1 %v1018_v0  ;;  %v1000_v27 = vld [vmem:[%s4564_s10 + $0x58] sm:$0xff]  ;;  %v999_v29 = vld [vmem:[%s4564_s10 + $0x50] sm:$0xff]  ;;  %v998_v19 = vld [vmem:[%s4564_s10 + $0x48] sm:$0xff] }
 0x119   : > { %2752 = vrot.lane.b32.xlu1 %v2751_v32, %s3056_s14  ;;  %2407 = vmatpush3.msra.mxu0 %v649_v40  ;;  %v654_v32 = vld [vmem:[%s4562_s8 + $0x98] sm:$0xff]  ;;  %v653_v36 = vld [vmem:[%s4562_s8 + $0x90] sm:$0xff]  ;;  %v1013_v39 = vld [vmem:[%s4564_s10 + $0xc0] sm:$0xff] }
 0x11a   : > { %2757 = vrot.lane.b32.xlu0 %v2756_v35, %s3056_s14  ;;  %2408 = vmatprep.subr.mxu0 %v664_v41  ;;  %v1014_v35 = vld [vmem:[%s4564_s10 + $0xc8] sm:$0xff]  ;;  %v637_v40 = vld [vmem:[%s4562_s8 + $0x10] sm:$0xff]  ;;  %v997_v41 = vld [vmem:[%s4564_s10 + $0x40] sm:$0xff] }
 0x11b   : > { %2409 = vmatpush3.msra.mxu0 %v648_v44  ;;  %2453 = vmatpush3.msra.mxu1 %v1002_v2  ;;  %v652_v44 = vld [vmem:[%s4562_s8 + $0x88] sm:$0xff]  ;;  %v987_v56 = vld [vmem:[%s4563_s9 + $0xf0] sm:$0xff]  ;;  %v968_v63 = vld [vmem:[%s4563_s9 + $0x58] sm:$0xff] }
 0x11c   : > { %2410 = vmatprep.subr.mxu0 %v663_v45  ;;  %2454 = vmatprep.subr.mxu1 %v1017_v4  ;;  %v1012_v45 = vld [vmem:[%s4564_s10 + $0xb8] sm:$0xff]  ;;  %v971_v57 = vld [vmem:[%s4563_s9 + $0x70] sm:$0xff]  ;;  %v970_v61 = vld [vmem:[%s4563_s9 + $0x68] sm:$0xff] }
 0x11d   : > { %2762 = vrot.lane.b32.xlu1 %v2761_v18, %s3056_s14  ;;  %2411 = vmatpush3.msra.mxu0 %v647_v46  ;;  %v638_v18 = vld [vmem:[%s4562_s8 + $0x18] sm:$0xff]  ;;  %v636_v46 = vld [vmem:[%s4562_s8 + $0x8] sm:$0xff]  ;;  %v963_v4 = vld [vmem:[%s4563_s9 + $0x30] sm:$0xff]  ;;  %s4626_s14 = sld [smem:[#allocation26_spill]] }
 0x11e   : > { %2412 = vmatprep.subr.mxu0 %v662_v47  ;;  %2455 = vmatpush3.msra.mxu1 %v1001_v10  ;;  %v996_v47 = vld [vmem:[%s4564_s10 + $0x38] sm:$0xff]  ;;  %v982_v0 = vld [vmem:[%s4563_s9 + $0xc8] sm:$0xff] }
 0x11f   : > { %2413 = vmatpush3.msra.mxu0 %v646_v48  ;;  %2456 = vmatprep.subr.mxu1 %v1016_v22  ;;  %v651_v48 = vld [vmem:[%s4562_s8 + $0x80] sm:$0xff]  ;;  %v980_v2 = vld [vmem:[%s4563_s9 + $0xb8] sm:$0xff]  ;;  %v962_v10 = vld [vmem:[%s4563_s9 + $0x28] sm:$0xff] }
 0x120   : > { %2414 = vmatprep.subr.mxu0 %v661_v49  ;;  %2457 = vmatpush3.msra.mxu1 %v1000_v27  ;;  %v1011_v49 = vld [vmem:[%s4564_s10 + $0xb0] sm:$0xff]  ;;  %v961_v22 = vld [vmem:[%s4563_s9 + $0x20] sm:$0xff]  ;;  %v976_v27 = vld [vmem:[%s4563_s9 + $0x98] sm:$0xff] }
 0x121   : > { %2415 = vmatpush3.msra.mxu0 %v645_v50  ;;  %2458 = vmatprep.subr.mxu1 %v1015_v28  ;;  %v635_v50 = vld [vmem:[%s4562_s8] sm:$0xff]  ;;  %v960_v28 = vld [vmem:[%s4563_s9 + $0x18] sm:$0xff] }
 0x122   : > { %2416 = vmatprep.subr.mxu0 %v660_v51  ;;  %2459 = vmatpush3.msra.mxu1 %v999_v29  ;;  %v995_v51 = vld [vmem:[%s4564_s10 + $0x30] sm:$0xff] }
 0x123   : > { %2417 = vmatpush3.msra.mxu0 %v644_v52  ;;  %2460 = vmatprep.subr.mxu1 %v1014_v35  ;;  %v988_v52 = vld [vmem:[%s4563_s9 + $0xf8] sm:$0xff]  ;;  %v975_v29 = vld [vmem:[%s4563_s9 + $0x90] sm:$0xff] }
 0x124   : > { %2418 = vmatprep.subr.mxu0 %v659_v55  ;;  %2461 = vmatpush3.msra.mxu1 %v998_v19  ;;  %v972_v55 = vld [vmem:[%s4563_s9 + $0x78] sm:$0xff]  ;;  %v959_v35 = vld [vmem:[%s4563_s9 + $0x10] sm:$0xff] }
 0x125   : > { %2419 = vmatpush3.msra.mxu0 %v643_v60  ;;  %2462 = vmatprep.subr.mxu1 %v1013_v39  ;;  %v986_v60 = vld [vmem:[%s4563_s9 + $0xe8] sm:$0xff]  ;;  %v1008_v19 = vld [vmem:[%s4564_s10 + $0x98] sm:$0xff] }
 0x126   : > { %2420 = vmatprep.subr.mxu0 %v658_v62  ;;  %2463 = vmatpush3.msra.mxu1 %v997_v41  ;;  %v984_v62 = vld [vmem:[%s4563_s9 + $0xd8] sm:$0xff] }
 0x127   : > { %2421 = vmatpush3.msra.mxu0 %v642_v1  ;;  %2464 = vmatprep.subr.mxu1 %v1012_v45  ;;  %v966_v1 = vld [vmem:[%s4563_s9 + $0x48] sm:$0xff]  ;;  %v992_v41 = vld [vmem:[%s4564_s10 + $0x18] sm:$0xff]  ;;  %v1007_v45 = vld [vmem:[%s4564_s10 + $0x90] sm:$0xff] }
 0x128   : > { %2422 = vmatprep.subr.mxu0 %v657_v3  ;;  %2465 = vmatpush3.msra.mxu1 %v996_v47  ;;  %v964_v3 = vld [vmem:[%s4563_s9 + $0x38] sm:$0xff]  ;;  %v991_v47 = vld [vmem:[%s4564_s10 + $0x10] sm:$0xff] }
 0x129   : > { %2423 = vmatpush3.msra.mxu0 %v641_v7  ;;  %2466 = vmatprep.subr.mxu1 %v1011_v49  ;;  %v978_v7 = vld [vmem:[%s4563_s9 + $0xa8] sm:$0xff] }
 0x12a   : > { %2424 = vmatprep.subr.mxu0 %v656_v11  ;;  %2467 = vmatpush3.msra.mxu1 %v995_v51  ;;  %v977_v11 = vld [vmem:[%s4563_s9 + $0xa0] sm:$0xff] }
 0x12b   : > { %2425 = vmatpush3.msra.mxu0 %v640_v23  ;;  %v1010_v23 = vld [vmem:[%s4564_s10 + $0xa8] sm:$0xff] }
 0x12c   : > { %2426 = vmatprep.subr.mxu0 %v655_v12  ;;  %2468 = vmatprep.subr.mxu1 %v1010_v23  ;;  %v994_v12 = vld [vmem:[%s4564_s10 + $0x28] sm:$0xff] }
 0x12d   : > { %2427 = vmatpush3.msra.mxu0 %v639_v13  ;;  %v1009_v13 = vld [vmem:[%s4564_s10 + $0xa0] sm:$0xff]  ;;  %2469 = vmatpush3.msra.mxu1 %v994_v12 }
 0x12e   : > { %2428 = vmatprep.subr.mxu0 %v654_v32  ;;  %v993_v32 = vld [vmem:[%s4564_s10 + $0x20] sm:$0xff]  ;;  %2470 = vmatprep.subr.mxu1 %v1009_v13 }
 0x12f   : > { %2429 = vmatpush3.msra.mxu0 %v638_v18  ;;  %2471 = vmatpush3.msra.mxu1 %v993_v32 }
 0x130   : > { %2430 = vmatprep.subr.mxu0 %v653_v36  ;;  %v974_v36 = vld [vmem:[%s4563_s9 + $0x88] sm:$0xff]  ;;  %2472 = vmatprep.subr.mxu1 %v1008_v19 }
 0x131   : > { %2431 = vmatpush3.msra.mxu0 %v637_v40  ;;  %2473 = vmatpush3.msra.mxu1 %v992_v41 }
 0x132   : > { %2432 = vmatprep.subr.mxu0 %v652_v44  ;;  %v958_v44 = vld [vmem:[%s4563_s9 + $0x8] sm:$0xff]  ;;  %2474 = vmatprep.subr.mxu1 %v1007_v45 }
 0x133   : > { %2433 = vmatpush3.msra.mxu0 %v636_v46  ;;  %v973_v46 = vld [vmem:[%s4563_s9 + $0x80] sm:$0xff]  ;;  %2475 = vmatpush3.msra.mxu1 %v991_v47 }
 0x134   : > { %2434 = vmatprep.subr.mxu0 %v651_v48 }
 0x135   : > { %2435 = vmatpush3.msra.mxu0 %v635_v50  ;;  %v957_v50 = vld [vmem:[%s4563_s9] sm:$0xff] }
 0x136   : > { %732 = vmatmul.mubr.f32.vlgmr.msra.gmra.mxu0 %v3374_v5  ;;  %2492 = vmatprep.subr.mxu0 %v988_v52  ;;  %v985_v5 = vld [vmem:[%s4563_s9 + $0xe0] sm:$0xff] }
 0x137   : > { %736 = vmatprep.mubr.f32.mxu0 %v3381_v9  ;;  %2493 = vmatpush3.msra.mxu0 %v972_v55  ;;  %v969_v9 = vld [vmem:[%s4563_s9 + $0x60] sm:$0xff] }
 0x138   : > { %2494 = vmatprep.subr.mxu0 %v987_v56 }
 0x139   : > { %2495 = vmatpush3.msra.mxu0 %v971_v57  ;;  %v1006_v57 = vld [vmem:[%s4564_s10 + $0x88] sm:$0xff] }
 0x13a   : > { %737 = vmatmul.mubr.f32.gmra.mxu0 %v3378_v8  ;;  %2496 = vmatprep.subr.mxu0 %v986_v60  ;;  %v983_v8 = vld [vmem:[%s4563_s9 + $0xd0] sm:$0xff] }
 0x13b   : > { %741 = vmatprep.mubr.f32.mxu0 %v3398_v15  ;;  %2497 = vmatpush3.msra.mxu0 %v970_v61  ;;  %v967_v15 = vld [vmem:[%s4563_s9 + $0x50] sm:$0xff] }
 0x13c   : > { %2498 = vmatprep.subr.mxu0 %v985_v5  ;;  %2476 = vmatprep.subr.mxu1 %v1006_v57 }
 0x13d   : > { %2499 = vmatpush3.msra.mxu0 %v969_v9 }
 0x13e   : > { %742 = vmatmul.mubr.f32.gmra.mxu0 %v3395_v14  ;;  %2500 = vmatprep.subr.mxu0 %v984_v62  ;;  %v981_v14 = vld [vmem:[%s4563_s9 + $0xc0] sm:$0xff]  ;;  %v990_v62 = vld [vmem:[%s4564_s10 + $0x8] sm:$0xff] }
 0x13f   : > { %746 = vmatprep.mubr.f32.mxu0 %v3416_v21  ;;  %2501 = vmatpush3.msra.mxu0 %v968_v63  ;;  %v965_v21 = vld [vmem:[%s4563_s9 + $0x40] sm:$0xff] }
 0x140   : > { %2502 = vmatprep.subr.mxu0 %v983_v8  ;;  %2477 = vmatpush3.msra.mxu1 %v990_v62 }
 0x141   : > { %2503 = vmatpush3.msra.mxu0 %v967_v15 }
 0x142   : > { %747 = vmatmul.mubr.f32.gmra.mxu0 %v3413_v20  ;;  %2504 = vmatprep.subr.mxu0 %v982_v0  ;;  %v979_v20 = vld [vmem:[%s4563_s9 + $0xb0] sm:$0xff] }
 0x143   : > { %2505 = vmatpush3.msra.mxu0 %v966_v1  ;;  %v989_v1 = vld [vmem:[%s4564_s10] sm:$0xff] }
 0x144   : > { %2506 = vmatprep.subr.mxu0 %v981_v14 }
 0x145   : > { %2507 = vmatpush3.msra.mxu0 %v965_v21 }
 0x146   : > { %2508 = vmatprep.subr.mxu0 %v980_v2 }
 0x147   : > { %2509 = vmatpush3.msra.mxu0 %v964_v3 }
 0x148   : > { %2510 = vmatprep.subr.mxu0 %v979_v20 }
 0x149   : > { %2511 = vmatpush3.msra.mxu0 %v963_v4 }
 0x14a   : > { %2512 = vmatprep.subr.mxu0 %v978_v7 }
 0x14b   : > { %2513 = vmatpush3.msra.mxu0 %v962_v10 }
 0x14c   : > { %2514 = vmatprep.subr.mxu0 %v977_v11 }
 0x14d   : > { %2515 = vmatpush3.msra.mxu0 %v961_v22 }
 0x14e   : > { %2516 = vmatprep.subr.mxu0 %v976_v27 }
 0x14f   : > { %2517 = vmatpush3.msra.mxu0 %v960_v28 }
 0x150   : > { %2518 = vmatprep.subr.mxu0 %v975_v29 }
 0x151   : > { %2519 = vmatpush3.msra.mxu0 %v959_v35 }
 0x152   : > { %2520 = vmatprep.subr.mxu0 %v974_v36 }
 0x153   : > { %2521 = vmatpush3.msra.mxu0 %v958_v44 }
 0x154   : > { %2522 = vmatprep.subr.mxu0 %v973_v46 }
 0x155   : > { %2523 = vmatpush3.msra.mxu0 %v957_v50 }
 0x17f   : > { %v2728_v18 = vpop.permute.xlu0 %2727 }
 0x180   : > { %v2730_v39 = vunpack.i.h.bf16 %v2728_v18  ;;  %v2729_v40 = vunpack.i.l.bf16 %v2728_v18 }
 0x182   : > { %v804_v48 = vsel %vm803_vm1, %v2729_v40, %v2730_v39  ;;  %v808_v49 = vsel %vm803_vm1, %v2730_v39, %v2729_v40 }
 0x183   : > { %v2738_v51 = vpop.permute.xlu0 %2737  ;;  %v2733_v52 = vpop.permute.xlu1 %2732  ;;  %v3818_v55 = vmax.f32 %v3438_v37, %v808_v49  ;;  %v3821_v56 = vmax.f32 %v3440_v38, %v804_v48  ;;  %v1005_v38 = vld [vmem:[%s4564_s10 + $0x80] sm:$0xff] }
 0x184   : > { %v2740_v60 = vunpack.i.h.bf16 %v2738_v51  ;;  %v2739_v61 = vunpack.i.l.bf16 %v2738_v51  ;;  %v2735_v5 = vunpack.i.h.bf16 %v2733_v52  ;;  %v2734_v9 = vunpack.i.l.bf16 %v2733_v52  ;;  %2478 = vmatprep.subr.mxu1 %v1005_v38 }
 0x185   : > { %v2766_v37 = vpack.i.bf16 %v3821_v56, %v3818_v55  ;;  %2479 = vmatpush3.msra.mxu1 %v989_v1 }
 0x186   : > { %v805_v63 = vsel %vm803_vm1, %v2739_v61, %v2740_v60  ;;  %v809_v8 = vsel %vm803_vm1, %v2740_v60, %v2739_v61  ;;  %v905_v15 = vsel %vm803_vm1, %v2734_v9, %v2735_v5  ;;  %v909_v0 = vsel %vm803_vm1, %v2735_v5, %v2734_v9 }
 0x187   : > { %2767 = vrot.lane.b32.xlu0 %v2766_v37, %s3057_s17  ;;  %v2743_v14 = vpop.permute.xlu1 %2742  ;;  %v3847_v21 = vmax.f32 %v3442_v42, %v809_v8  ;;  %v3850_v2 = vmax.f32 %v3444_v43, %v805_v63  ;;  %v3853_v3 = vmax.f32 %v3460_v53, %v909_v0  ;;  %v3856_v20 = vmax.f32 %v3462_v54, %v905_v15 }
 0x188   : > { %v2748_v4 = vpop.permute.xlu0 %2747  ;;  %v2745_v7 = vunpack.i.h.bf16 %v2743_v14  ;;  %v2744_v10 = vunpack.i.l.bf16 %v2743_v14  ;;  %v3058_v60 = vmov 0.0  }
 0x189   : > { %v2750_v11 = vunpack.i.h.bf16 %v2748_v4  ;;  %v2749_v22 = vunpack.i.l.bf16 %v2748_v4  ;;  %v2776_v23 = vpack.i.bf16 %v3850_v2, %v3847_v21  ;;  %v2771_v42 = vpack.i.bf16 %v3856_v20, %v3853_v3  ;;  %2567 = vmatprep.subr.mxu1 %v3058_v60  ;;  %2556 = vmatprep.subr.mxu0 %v3058_v60 }
 0x18a   : > { %v906_v43 = vsel %vm803_vm1, %v2744_v10, %v2745_v7  ;;  %v910_v53 = vsel %vm803_vm1, %v2745_v7, %v2744_v10 }
 0x18b   : > { %v806_v54 = vsel %vm803_vm1, %v2749_v22, %v2750_v11  ;;  %v810_v27 = vsel %vm803_vm1, %v2750_v11, %v2749_v22  ;;  %2777 = vrot.lane.b32.xlu0 %v2776_v23, %s3057_s17  ;;  %v2753_v12 = vpop.permute.xlu1 %2752  ;;  %2772 = vrot.lane.b32.xlu1 %v2771_v42, %s3057_s17  ;;  %v3873_v28 = vmax.f32 %v3465_v58, %v910_v53 }
 0x18c   : > { %v2758_v13 = vpop.permute.xlu0 %2757  ;;  %v2755_v29 = vunpack.i.h.bf16 %v2753_v12  ;;  %v2754_v32 = vunpack.i.l.bf16 %v2753_v12  ;;  %v3876_v35 = vmax.f32 %v3485_v6, %v810_v27  ;;  %v3879_v18 = vmax.f32 %v3488_v16, %v806_v54 }
 0x18d   : > { %v2760_v19 = vunpack.i.h.bf16 %v2758_v13  ;;  %v2759_v36 = vunpack.i.l.bf16 %v2758_v13  ;;  %v3882_v39 = vmax.f32 %v3468_v59, %v906_v43 }
 0x18e   : > { %v907_v40 = vsel %vm803_vm1, %v2754_v32, %v2755_v29  ;;  %v911_v58 = vsel %vm803_vm1, %v2755_v29, %v2754_v32  ;;  %v2786_v41 = vpack.i.bf16 %v3879_v18, %v3876_v35 }
 0x18f   : > { %v807_v6 = vsel %vm803_vm1, %v2759_v36, %v2760_v19  ;;  %v811_v16 = vsel %vm803_vm1, %v2760_v19, %v2759_v36  ;;  %v2763_v44 = vpop.permute.xlu1 %2762  ;;  %v2781_v59 = vpack.i.bf16 %v3882_v39, %v3873_v28  ;;  %v3897_v45 = vmax.f32 %v3491_v17, %v911_v58 }
 0x190   : > { %2787 = vrot.lane.b32.xlu0 %v2786_v41, %s3057_s17  ;;  %v2765_v46 = vunpack.i.h.bf16 %v2763_v44  ;;  %v2764_v47 = vunpack.i.l.bf16 %v2763_v44  ;;  %v3901_v48 = vmax.f32 %v3508_v30, %v811_v16  ;;  %v3904_v49 = vmax.f32 %v3511_v31, %v807_v6 }
 0x191   : > { %2782 = vrot.lane.b32.xlu1 %v2781_v59, %s3057_s17  ;;  %v3908_v50 = vmax.f32 %v3494_v26, %v907_v40 }
 0x192   : > { %v908_v51 = vsel %vm803_vm1, %v2764_v47, %v2765_v46  ;;  %v912_v17 = vsel %vm803_vm1, %v2765_v46, %v2764_v47  ;;  %v2796_v52 = vpack.i.bf16 %v3904_v49, %v3901_v48 }
 0x193   : > { %v2791_v30 = vpack.i.bf16 %v3908_v50, %v3897_v45  ;;  %v3919_v31 = vmax.f32 %v3517_v33, %v912_v17  ;;  %v3922_v57 = vmax.f32 %v3520_v34, %v908_v51 }
 0x194   : > { %2797 = vrot.lane.b32.xlu0 %v2796_v52, %s3057_s17 }
 0x195   : > { %2792 = vrot.lane.b32.xlu1 %v2791_v30, %s3057_s17  ;;  %v2801_v26 = vpack.i.bf16 %v3922_v57, %v3919_v31 }
 0x199   : > { %2802 = vrot.lane.b32.xlu1 %v2801_v26, %s3057_s17 }
 0x1f6   : > { %v3932_v5 = vpop.f32.mrf.mxu0 }
 0x1f8   : > { %v3938_v37 = vpop.f32.mrf.mxu0 }
 0x1f9   : > { %v2768_v33 = vpop.permute.xlu0 %2767 }
 0x1fa   : > { %v2770_v61 = vunpack.i.h.bf16 %v2768_v33  ;;  %v2769_v34 = vunpack.i.l.bf16 %v2768_v33  ;;  %v3942_v7 = vpop.f32.mrf.mxu0 }
 0x1fc   : > { %v837_v9 = vsel %vm836_vm2, %v2769_v34, %v2770_v61  ;;  %v841_v62 = vsel %vm836_vm2, %v2770_v61, %v2769_v34 }
 0x1fd   : > { %v2778_v38 = vpop.permute.xlu0 %2777  ;;  %v2773_v63 = vpop.permute.xlu1 %2772  ;;  %v845_v8 = vmax.f32 %v3818_v55, %v841_v62  ;;  %v846_v15 = vmax.f32 %v3821_v56, %v837_v9 }
 0x1fe   : > { %v2780_v0 = vunpack.i.h.bf16 %v2778_v38  ;;  %v2779_v1 = vunpack.i.l.bf16 %v2778_v38  ;;  %v2775_v14 = vunpack.i.h.bf16 %v2773_v63  ;;  %v2774_v4 = vunpack.i.l.bf16 %v2773_v63  ;;  %v2440_v56 = vpop.f32.mrf.mxu0 }
 0x1ff   : > { %v853_v10 = vmax.f32 %v845_v8, %v846_v15 }
 0x200   : > { %v838_v11 = vsel %vm836_vm2, %v2779_v1, %v2780_v0  ;;  %v842_v22 = vsel %vm836_vm2, %v2780_v0, %v2779_v1  ;;  %v937_v23 = vsel %vm836_vm2, %v2774_v4, %v2775_v14  ;;  %v941_v55 = vsel %vm836_vm2, %v2775_v14, %v2774_v4  ;;  %v2442_v12 = vpop.f32.mrf.mxu0 }
 0x201   : > { %1170 = vmatprep.mubr.f32.mxu0 %v853_v10  ;;  %v945_v42 = vmax.f32 %v3853_v3, %v941_v55  ;;  %v946_v43 = vmax.f32 %v3856_v20, %v937_v23  ;;  %v847_v53 = vmax.f32 %v3847_v21, %v842_v22  ;;  %v848_v54 = vmax.f32 %v3850_v2, %v838_v11 }
 0x202   : > { %v2788_v27 = vpop.permute.xlu0 %2787  ;;  %1171 = vmatmul.mubr.f32.vlgmr.msra.gmra.mxu0 %v853_v10  ;;  %v2443_v41 = vpop.f32.mrf.mxu0  ;;  %v2441_v11 = vadd.f32 %v2440_v56, %v3942_v7  ;;  %v2438_v22 = vadd.f32 %v3938_v37, %v3932_v5  ;;  %v3060_v5 = vmov 0  }
 0x203   : > { %v2790_v13 = vunpack.i.h.bf16 %v2788_v27  ;;  %v2789_v29 = vunpack.i.l.bf16 %v2788_v27  ;;  %v2783_v32 = vpop.permute.xlu1 %2782  ;;  %v953_v19 = vmax.f32 %v945_v42, %v946_v43  ;;  %v854_v36 = vmax.f32 %v847_v53, %v848_v54  ;;  %2806 = vset.pattern.permute.xlu0 %v3060_v5  ;;  %2807 = vset.pattern.permute.xlu1 %v3060_v5 }
 0x204   : > { %v2785_v40 = vunpack.i.h.bf16 %v2783_v32  ;;  %v2784_v58 = vunpack.i.l.bf16 %v2783_v32  ;;  %v2445_v44 = vpop.f32.mrf.mxu0  ;;  %v2444_v33 = vadd.f32 %v2443_v41, %v2442_v12 }
 0x205   : > { %v839_v3 = vsel %vm836_vm2, %v2789_v29, %v2790_v13  ;;  %v843_v20 = vsel %vm836_vm2, %v2790_v13, %v2789_v29  ;;  %1085 = vmatprep.mubr.f32.mxu1 %v953_v19  ;;  %1175 = vmatprep.mubr.f32.mxu0 %v854_v36 }
 0x206   : > { %v938_v21 = vsel %vm836_vm2, %v2784_v58, %v2785_v40  ;;  %v942_v2 = vsel %vm836_vm2, %v2785_v40, %v2784_v58  ;;  %v2798_v6 = vpop.permute.xlu0 %2797  ;;  %1086 = vmatmul.mubr.f32.vlgmr.msra.gmra.mxu1 %v953_v19  ;;  %1176 = vmatmul.mubr.f32.gmra.mxu0 %v854_v36  ;;  %v849_v16 = vmax.f32 %v3876_v35, %v843_v20  ;;  %v2446_v61 = vpop.f32.mrf.mxu0 }
 0x207   : > { %v2800_v59 = vunpack.i.h.bf16 %v2798_v6  ;;  %v2799_v46 = vunpack.i.l.bf16 %v2798_v6  ;;  %v2793_v47 = vpop.permute.xlu1 %2792  ;;  %v947_v51 = vmax.f32 %v3873_v28, %v942_v2  ;;  %v948_v17 = vmax.f32 %v3882_v39, %v938_v21 }
 0x208   : > { %v2795_v52 = vunpack.i.h.bf16 %v2793_v47  ;;  %v2794_v30 = vunpack.i.l.bf16 %v2793_v47  ;;  %v850_v26 = vmax.f32 %v3879_v18, %v839_v3  ;;  %v2447_v62 = vadd.f32 %v2446_v61, %v2445_v44 }
 0x209   : > { %v840_v34 = vsel %vm836_vm2, %v2799_v46, %v2800_v59  ;;  %v844_v35 = vsel %vm836_vm2, %v2800_v59, %v2799_v46  ;;  %v954_v9 = vmax.f32 %v947_v51, %v948_v17  ;;  %v1192_v51 = vld [vmem:[#allocation8] sm:$0xff] }
 0x20a   : > { %v939_v38 = vsel %vm836_vm2, %v2794_v30, %v2795_v52  ;;  %v943_v28 = vsel %vm836_vm2, %v2795_v52, %v2794_v30  ;;  %v855_v39 = vmax.f32 %v849_v16, %v850_v26  ;;  %v851_v63 = vmax.f32 %v3901_v48, %v844_v35  ;;  %2568 = vmatpush3.msra.mxu1 %v2447_v62  ;;  %v1359_v30 = vld [vmem:[%s4560_s6] sm:$0xff] }
 0x20b   : > { %v2803_v18 = vpop.permute.xlu1 %2802  ;;  %1090 = vmatprep.mubr.f32.mxu1 %v954_v9  ;;  %v949_v8 = vmax.f32 %v3897_v45, %v943_v28  ;;  %v950_v15 = vmax.f32 %v3908_v50, %v939_v38  ;;  %v852_v0 = vmax.f32 %v3904_v49, %v840_v34  ;;  %2569 = vmatprep.subr.mxu1 %v3058_v60 }
 0x20c   : > { %v2805_v1 = vunpack.i.h.bf16 %v2803_v18  ;;  %v2804_v14 = vunpack.i.l.bf16 %v2803_v18  ;;  %1180 = vmatprep.mubr.f32.mxu0 %v855_v39  ;;  %1091 = vmatmul.mubr.f32.gmra.mxu1 %v954_v9 }
 0x20d   : > { %1181 = vmatmul.mubr.f32.gmra.mxu0 %v855_v39  ;;  %v955_v4 = vmax.f32 %v949_v8, %v950_v15  ;;  %v856_v10 = vmax.f32 %v851_v63, %v852_v0  ;;  %2570 = vmatpush3.msra.mxu1 %v2444_v33  ;;  %v1360_v8 = vld [vmem:[%s4560_s6 + $0x8] sm:$0xff]  ;;  %v1361_v15 = vld [vmem:[%s4560_s6 + $0x10] sm:$0xff]  ;;  %v1362_v0 = vld [vmem:[%s4560_s6 + $0x18] sm:$0xff] }
 0x20e   : > { %v940_v48 = vsel %vm836_vm2, %v2804_v14, %v2805_v1  ;;  %v944_v45 = vsel %vm836_vm2, %v2805_v1, %v2804_v14  ;;  %2571 = vmatprep.subr.mxu1 %v3058_v60  ;;  %v1477_v1 = vld [vmem:[%s4561_s7] sm:$0xff] }
 0x20f   : > { %1095 = vmatprep.mubr.f32.mxu1 %v955_v4  ;;  %1185 = vmatprep.mubr.f32.mxu0 %v856_v10  ;;  %v951_v49 = vmax.f32 %v3919_v31, %v944_v45  ;;  %v952_v50 = vmax.f32 %v3922_v57, %v940_v48  ;;  %v1340_v31 = vld [vmem:[%s4558_s4] sm:$0xff]  ;;  %v1600_v48 = vld [vmem:[%s4626_s14 + $0x10] sm:$0xff]  ;;  %v1599_v45 = vld [vmem:[%s4626_s14 + $0x8] sm:$0xff] }
 0x210   : > { %1096 = vmatmul.mubr.f32.gmra.mxu1 %v955_v4  ;;  %v1347_v57 = vld [vmem:[%s4559_s5] sm:$0xff]  ;;  %1343 = vperm.xlu0 %2806, %v1340_v31   ;;  %v1478_v4 = vld [vmem:[%s4561_s7 + $0x8] sm:$0xff] }
 0x211   : > { %1186 = vmatmul.mubr.f32.gmra.mxu0 %v856_v10  ;;  %v956_v7 = vmax.f32 %v951_v49, %v952_v50  ;;  %2572 = vmatpush3.msra.mxu1 %v2441_v11  ;;  %v1601_v10 = vld [vmem:[%s4626_s14 + $0x18] sm:$0xff]  ;;  %v1479_v11 = vld [vmem:[%s4561_s7 + $0x10] sm:$0xff]  ;;  %v1598_v49 = vld [vmem:[%s4626_s14] sm:$0xff] }
 0x212   : > { %2573 = vmatprep.subr.mxu1 %v3058_v60  ;;  %2564 = vmatprep.mubr.msk.f32.mxu0 %vm3059_vm3, %v3058_v60  ;;  %v1480_v50 = vld [vmem:[%s4561_s7 + $0x18] sm:$0xff] }
 0x213   : > { %1100 = vmatprep.mubr.f32.mxu1 %v956_v7  ;;  %2574 = vmatpush3.msra.mxu1 %v2438_v22  ;;  %v4051_v22 = vld [vmem:[%s3347_s20 + $0x38] sm:$0xff] }
 0x214   : > { %1101 = vmatmul.mubr.f32.gmra.mxu1 %v956_v7  ;;  %1350 = vperm.xlu1 %2807, %v1347_v57  }
 0x215   : > { %2575 = vmatprep.mubr.msk.f32.mxu1 %vm3059_vm3, %v3058_v60 }
 0x218   : > { %2576 = vmatmul.mubr.msk.f32.vlgmr.msra.gmra.mxu1 %vm1193_vm4, %v1191_v25 }
 0x219   : > { %2580 = vmatprep.mubr.msk.f32.mxu1 %vm1363_vm5, %v1359_v30  ;;  %v1938_v30 = vld [vmem:[%s4629_s19 + $0xe0] sm:$0xff] }
 0x28b   : > { %v1344_v33 = vpop.permute.xlu0 %1343 }
 0x28f   : > { %v1351_v34 = vpop.permute.xlu1 %1350 }
 0x2c2   : > { %v2524_v37 = vpop.f32.mrf.mxu0 }
 0x2c4   : > { %v2525_v23 = vpop.f32.mrf.mxu0 }
 0x2c5   : > { %v2526_v59 = vadd.f32 %v2525_v23, %v2524_v37  ;;  %v1707_v23 = vld [vmem:[#allocation10 + $0x18] sm:$0xff] }
 0x2c6   : > { %v2480_v55 = vpop.f32.mrf.mxu1  ;;  %v2527_v56 = vpop.f32.mrf.mxu0 }
 0x2c8   : > { %v2481_v42 = vpop.f32.mrf.mxu1  ;;  %v2528_v43 = vpop.f32.mrf.mxu0 }
 0x2c9   : > { %v2482_v6 = vadd.f32 %v2481_v42, %v2480_v55  ;;  %v2529_v16 = vadd.f32 %v2528_v43, %v2527_v56  ;;  %v1706_v56 = vld [vmem:[#allocation10 + $0x10] sm:$0xff]  ;;  %v1705_v42 = vld [vmem:[#allocation10 + $0x8] sm:$0xff] }
 0x2cb   : > { %v1173_v47 = vadd.f32 %v2526_v59, %v2482_v6  ;;  %v1941_v6 = vld [vmem:[%s4628_s23 + $0xf8] sm:$0xff]  ;;  %v4086_v59 = vld [vmem:[%s3347_s20 + $0x8] sm:$0xff]  ;;  %s2976_s23 = scalar_lea.vmem %s2975_s16, 2048 }
 0x2cc   : > { %v2483_v53 = vpop.f32.mrf.mxu1 }
 0x2cd   : > { %v2530_v54 = vpop.f32.mrf.mxu0 }
 0x2ce   : > { %v2484_v27 = vpop.f32.mrf.mxu1 }
 0x2cf   : > { %v2531_v12 = vpop.f32.mrf.mxu0  ;;  %v2485_v20 = vadd.f32 %v2484_v27, %v2483_v53  ;;  %v1704_v53 = vld [vmem:[#allocation10] sm:$0xff] }
 0x2d0   : > { %v2486_v13 = vpop.f32.mrf.mxu1  ;;  %v2532_v21 = vadd.f32 %v2531_v12, %v2530_v54 }
 0x2d1   : > { %v2533_v29 = vpop.f32.mrf.mxu0  ;;  %v1178_v46 = vadd.f32 %v2529_v16, %v2485_v20  ;;  %v4069_v20 = vld [vmem:[%s3347_s20 + $0x20] sm:$0xff] }
 0x2d2   : > { %v2487_v32 = vpop.f32.mrf.mxu1 }
 0x2d3   : > { %v2534_v19 = vpop.f32.mrf.mxu0  ;;  %v2488_v58 = vadd.f32 %v2487_v32, %v2486_v13 }
 0x2d4   : > { %v2489_v36 = vpop.f32.mrf.mxu1  ;;  %v2535_v41 = vadd.f32 %v2534_v19, %v2533_v29  ;;  %v2005_v19 = vld [vmem:[%s4627_s28 + $0xf8] sm:$0xff] }
 0x2d5   : > { %v1183_v44 = vadd.f32 %v2532_v21, %v2488_v58  ;;  %v4074_v21 = vld [vmem:[%s3347_s20 + $0x18] sm:$0xff] }
 0x2d6   : > { %v2490_v40 = vpop.f32.mrf.mxu1 }
 0x2d7   : > { %v2491_v3 = vadd.f32 %v2490_v40, %v2489_v36  ;;  %v4061_v36 = vld [vmem:[%s3347_s20 + $0x30] sm:$0xff] }
 0x2d8   : > { %v1336_v17 = vpop.f32.mrf.mxu1 }
 0x2d9   : > { %v1188_v2 = vadd.f32 %v2535_v41, %v2491_v3  ;;  %v4065_v41 = vld [vmem:[%s3347_s20 + $0x28] sm:$0xff] }
 0x2da   : > { %v2577_v52 = vpop.f32.mrf.mxu1 }
 0x2db   : > { %2557 = vmatpush3.msra.mxu0 %v1188_v2  ;;  %v4079_v2 = vld [vmem:[%s3347_s20 + $0x10] sm:$0xff]  ;;  %v1939_v52 = vld [vmem:[%s4629_s19 + $0xe8] sm:$0xff] }
 0x2dc   : > { %2558 = vmatprep.subr.mxu0 %v3058_v60 }
 0x2dd   : > { %2559 = vmatpush3.msra.mxu0 %v1183_v44 }
 0x2de   : > { %2560 = vmatprep.subr.mxu0 %v3058_v60 }
 0x2df   : > { %2561 = vmatpush3.msra.mxu0 %v1178_v46  ;;  %v4090_v46 = vld [vmem:[%s3347_s20] sm:$0xff]  ;;  %s2234_s20 = sshll.u32 %s618_s15, 4  ;;  %s4510_s20 = int_to_ptr.vmem [resolvable:$true] %s2234_s20 }
 0x2e0   : > { %2562 = vmatprep.subr.mxu0 %v3058_v60  ;;  %s2970_s17 = scalar_lea.vmem %s4510_s20, 1024  ;;  %p2977_p6 = scmp.lt.s32.totalorder %s4510_s20, %s2975_s16 }
 0x2e1   : > { %2563 = vmatpush3.msra.mxu0 %v1173_v47  ;;  %p2971_p0 = scmp.ne.s32.totalorder %s4510_s20, %s2970_s17  ;;  %p2978_p4 = scmp.lt.s32.totalorder %s2976_s23, %s2970_s17 }
 0x2e2   : > { %2565 = vmatmul.mubr.msk.f32.vlgmr.msra.gmra.mxu0 %vm1193_vm4, %v1192_v51  ;;  %1748 = vmatprep.subr.mxu0 %v1707_v23  ;;  %v1971_v23 = vld [vmem:[%s4629_s19 + $0x1e8] sm:$0xff] }
 0x2e3   : > { %1784 = vmatprep.mubr.f32.mxu0 %v3058_v60  ;;  %1749 = vmatpush1.msra.mxu0 %v1706_v56  ;;  %v1969_v56 = vld [vmem:[%s4629_s19 + $0x1d8] sm:$0xff]  ;;  %p2972_p1 = pnand %p2971_p0, %p3253_p9  ;;  %p2979_p8 = por %p2978_p4, %p2977_p6 }
 0x2e4   : > { %1750 = vmatprep.subr.mxu0 %v1705_v42  ;;  %v1968_v42 = vld [vmem:[%s4629_s19 + $0x1d0] sm:$0xff] }
 0x2e5   : > { %1751 = vmatpush1.msra.mxu0 %v1704_v53  ;;  %v1966_v53 = vld [vmem:[%s4629_s19 + $0x1c0] sm:$0xff]  ;;  %p2973_p3 = pneg %p2972_p1 }
 0x2e6   : > { %2038 = vmatprep.subr.mxu0 %v2005_v19  ;;  %v1959_v19 = vld [vmem:[%s4629_s19 + $0x188] sm:$0xff] }
 0x2e7   : > { %p2980_p5 = pnand %p2979_p8, %p2973_p3 }
 0x3a2   : > { %v1263_v26 = vpop.f32.mrf.mxu0 }
 0x3a3   : > { %v1337_v61 = vadd.f32 %v1336_v17, %v1263_v26  ;;  %v1940_v17 = vld [vmem:[%s4629_s19 + $0xf0] sm:$0xff]  ;;  %v1937_v26 = vld [vmem:[%s4629_s19 + $0xd8] sm:$0xff] }
 0x3a4   : > { %v2566_v35 = vpop.f32.mrf.mxu0 }
 0x3a5   : > { %v1346_v9 = vmul.f32 %v1344_v33, %v1337_v61  ;;  %v1936_v33 = vld [vmem:[%s4629_s19 + $0xd0] sm:$0xff]  ;;  %v1935_v61 = vld [vmem:[%s4629_s19 + $0xc8] sm:$0xff]  ;;  %v1933_v35 = vld [vmem:[%s4629_s19 + $0xb8] sm:$0xff] }
 0x3a7   : > { %v1353_v62 = vadd.f32 %v1351_v34, %v1346_v9  ;;  %v1934_v34 = vld [vmem:[%s4629_s19 + $0xc0] sm:$0xff]  ;;  %v1932_v9 = vld [vmem:[%s4629_s19 + $0xb0] sm:$0xff] }
 0x3a9   : > { %v1354_v38 = vadd.f32 3.0, %v1353_v62 }
 0x3ab   : > { %v1355_v28 = vmax.f32 %v1354_v38, 0.0  ;;  %v1930_v38 = vld [vmem:[%s4629_s19 + $0xa0] sm:$0xff] }
 0x3ad   : > { %v1356_v39 = vmin.f32 %v1355_v28, 6.0  ;;  %v1929_v28 = vld [vmem:[%s4629_s19 + $0x98] sm:$0xff] }
 0x3af   : > { %v1357_v63 = vmul.f32 0.16666667, %v1356_v39  ;;  %v1928_v39 = vld [vmem:[%s4629_s19 + $0x90] sm:$0xff] }
 0x3b1   : > { %v1358_v18 = vmul.f32 %v1357_v63, %v1353_v62  ;;  %v1931_v62 = vld [vmem:[%s4629_s19 + $0xa8] sm:$0xff] }
 0x3b2   : > { %v1927_v63 = vld [vmem:[%s4629_s19 + $0x88] sm:$0xff] }
 0x3b3   : > { %1482 = vrot.lane.b32.xlu1 %v1358_v18, %s3061_s30  ;;  %2578 = vmatprep.subr.mxu1 %v1358_v18  ;;  %s4630_s30 = sld [smem:[#allocation30_spill]] }
 0x3b4   : > { %2579 = vmatpush3.msra.mxu1 %v1358_v18  ;;  %v1926_v18 = vld [vmem:[%s4629_s19 + $0x80] sm:$0xff] }
 0x3b5   : > { %2581 = vmatmul.mubr.msk.f32.vlgmr.msra.gmra.mxu1 %vm1363_vm5, %v1360_v8  ;;  %v1925_v8 = vld [vmem:[%s4629_s19 + $0x78] sm:$0xff] }
 0x3b6   : > { %2583 = vmatprep.mubr.msk.f32.mxu1 %vm1363_vm5, %v1361_v15  ;;  %v1924_v15 = vld [vmem:[%s4629_s19 + $0x70] sm:$0xff] }
 0x3b9   : > { %2584 = vmatmul.mubr.msk.f32.gmra.mxu1 %vm1363_vm5, %v1362_v0  ;;  %v1835_v51 = vld [vmem:[%s4630_s30] sm:$0x1]  ;;  %v1923_v0 = vld [vmem:[%s4629_s19 + $0x68] sm:$0xff] }
 0x3ba   : > { %2588 = vmatprep.mubr.msk.f32.mxu1 %vm1363_vm5, %v1477_v1  ;;  %v1922_v1 = vld [vmem:[%s4629_s19 + $0x60] sm:$0xff] }
 0x425   : > { %v1483_v14 = vpop.permute.xlu1 %1482 }
 0x426   : > { %2586 = vmatprep.subr.mxu1 %v1483_v14 }
 0x427   : > { %2587 = vmatpush3.msra.mxu1 %v1483_v14  ;;  %v1921_v14 = vld [vmem:[%s4629_s19 + $0x58] sm:$0xff] }
 0x428   : > { %2589 = vmatmul.mubr.msk.f32.vlgmr.msra.gmra.mxu1 %vm1363_vm5, %v1478_v4  ;;  %1643 = vmatprep.subr.mxu1 %v1601_v10  ;;  %v1920_v4 = vld [vmem:[%s4629_s19 + $0x50] sm:$0xff]  ;;  %v1919_v10 = vld [vmem:[%s4629_s19 + $0x48] sm:$0xff] }
 0x429   : > { %2591 = vmatprep.mubr.msk.f32.mxu1 %vm1363_vm5, %v1479_v11  ;;  %1644 = vmatpush1.msra.mxu1 %v1600_v48  ;;  %v1918_v11 = vld [vmem:[%s4629_s19 + $0x40] sm:$0xff]  ;;  %v1917_v48 = vld [vmem:[%s4629_s19 + $0x38] sm:$0xff] }
 0x42a   : > { %1645 = vmatprep.subr.mxu1 %v1599_v45  ;;  %v1916_v45 = vld [vmem:[%s4629_s19 + $0x30] sm:$0xff] }
 0x42b   : > { %1646 = vmatpush1.msra.mxu1 %v1598_v49  ;;  %v1915_v49 = vld [vmem:[%s4629_s19 + $0x28] sm:$0xff] }
 0x42c   : > { %2592 = vmatmul.mubr.msk.f32.gmra.mxu1 %vm1363_vm5, %v1480_v50  ;;  %1863 = vmatprep.subr.mxu1 %v4051_v22  ;;  %v1914_v50 = vld [vmem:[%s4629_s19 + $0x20] sm:$0xff] }
 0x42d   : > { %1679 = vmatprep.mubr.f32.mxu1 %v3058_v60 }
 0x475   : > { %v2582_v7 = vpop.f32.mrf.mxu1 }
 0x476   : > { %v1462_v25 = vmul.f32 0.5, %v2582_v7  ;;  %v1913_v7 = vld [vmem:[%s4629_s19 + $0x18] sm:$0xff] }
 0x477   : > { %v1442_v31 = vpop.f32.mrf.mxu1 }
 0x478   : > { %v1461_v57 = vmul.f32 0.5, %v1442_v31  ;;  %2808 = vtanh.f32 %v1462_v25  ;;  %v1912_v25 = vld [vmem:[%s4629_s19 + $0x10] sm:$0xff]  ;;  %v1911_v31 = vld [vmem:[%s4629_s19 + $0x8] sm:$0xff] }
 0x479   : > { %v2585_v5 = vpop.f32.mrf.mxu1 }
 0x47a   : > { %2810 = vtanh.f32 %v1461_v57  ;;  %v1464_v43 = vmul.f32 0.5, %v2585_v5  ;;  %v1910_v57 = vld [vmem:[%s4629_s19] sm:$0xff]  ;;  %v1973_v5 = vld [vmem:[%s4629_s19 + $0x1f8] sm:$0xff] }
 0x47b   : > { %v1452_v37 = vpop.f32.mrf.mxu1 }
 0x47c   : > { %v1463_v55 = vmul.f32 0.5, %v1452_v37  ;;  %v1972_v37 = vld [vmem:[%s4629_s19 + $0x1f0] sm:$0xff] }
 0x47e   : > { %2812 = vtanh.f32 %v1463_v55  ;;  %v1970_v55 = vld [vmem:[%s4629_s19 + $0x1e0] sm:$0xff] }
 0x47f   : > { %2814 = vtanh.f32 %v1464_v43  ;;  %v1967_v43 = vld [vmem:[%s4629_s19 + $0x1c8] sm:$0xff] }
 0x485   : > { %v2809_v54 = vpop.eup %2808 }
 0x486   : > { %v1470_v13 = vmul.f32 0.5, %v2809_v54  ;;  %v1965_v54 = vld [vmem:[%s4629_s19 + $0x1b8] sm:$0xff] }
 0x487   : > { %v2811_v27 = vpop.eup %2810 }
 0x488   : > { %v1469_v12 = vmul.f32 0.5, %v2811_v27  ;;  %v1474_v40 = vadd.f32 0.5, %v1470_v13  ;;  %v1964_v27 = vld [vmem:[%s4629_s19 + $0x1b0] sm:$0xff]  ;;  %v1962_v13 = vld [vmem:[%s4629_s19 + $0x1a0] sm:$0xff] }
 0x48a   : > { %v1473_v29 = vadd.f32 0.5, %v1469_v12  ;;  %v1963_v12 = vld [vmem:[%s4629_s19 + $0x1a8] sm:$0xff] }
 0x48b   : > { %v2813_v32 = vpop.eup %2812 }
 0x48c   : > { %2387 = vmatmul.mubr.msk.f32.vlgmr.msra.gmra.mxu1 %vm1602_vm6, %v1473_v29  ;;  %v1471_v58 = vmul.f32 0.5, %v2813_v32  ;;  %v2815_v3 = vpop.eup %2814  ;;  %v1961_v29 = vld [vmem:[%s4629_s19 + $0x198] sm:$0xff]  ;;  %v1960_v32 = vld [vmem:[%s4629_s19 + $0x190] sm:$0xff] }
 0x48d   : > { %1685 = vmatprep.mubr.f32.mxu1 %v3058_v60  ;;  %1864 = vmatpush1.msra.mxu1 %v4061_v36  ;;  %v1472_v16 = vmul.f32 0.5, %v2815_v3  ;;  %v1826_v3 = vmax.f32 %v4086_v59, %v4065_v41 }
 0x48e   : > { %1865 = vmatprep.subr.mxu1 %v4065_v41  ;;  %v1475_v44 = vadd.f32 0.5, %v1471_v58  ;;  %v1957_v58 = vld [vmem:[%s4629_s19 + $0x178] sm:$0xff] }
 0x48f   : > { %1866 = vmatpush1.msra.mxu1 %v4069_v20  ;;  %v1476_v47 = vadd.f32 0.5, %v1472_v16  ;;  %v1956_v16 = vld [vmem:[%s4629_s19 + $0x170] sm:$0xff] }
 0x490   : > { %2388 = vmatmul.mubr.msk.f32.gmra.mxu1 %vm1602_vm6, %v1474_v40  ;;  %1867 = vmatprep.subr.mxu1 %v4074_v21  ;;  %v1958_v40 = vld [vmem:[%s4629_s19 + $0x180] sm:$0xff] }
 0x491   : > { %1691 = vmatprep.mubr.f32.mxu1 %v3058_v60  ;;  %1868 = vmatpush1.msra.mxu1 %v4079_v2 }
 0x492   : > { %1869 = vmatprep.subr.mxu1 %v4086_v59 }
 0x493   : > { %1870 = vmatpush1.msra.mxu1 %v4090_v46 }
 0x494   : > { %2389 = vmatmul.mubr.msk.f32.gmra.mxu1 %vm1602_vm6, %v1475_v44  ;;  %2109 = vmatprep.subr.mxu1 %v1941_v6  ;;  %v1827_v6 = vmax.f32 %v4074_v21, %v4051_v22  ;;  %v1817_v44 = vmax.f32 %v4090_v46, %v4069_v20 }
 0x495   : > { %1697 = vmatprep.mubr.f32.mxu1 %v3058_v60 }
 0x498   : > { %2390 = vmatmul.mubr.msk.f32.gmra.mxu1 %vm1602_vm6, %v1476_v47  ;;  %v1818_v47 = vmax.f32 %v4079_v2, %v4061_v36 }
 0x499   : > { %1903 = vmatprep.mubr.f32.mxu1 %v3058_v60 }
 0x49c   : > { %2395 = vmatmul.mubr.msk.f32.vlgmr.msra.gmra.mxu1 %vm1193_vm4, %v1835_v51  ;;  %v1955_v51 = vld [vmem:[%s4629_s19 + $0x168] sm:$0xff] }
 0x49d   : > { %2110 = vmatpush1.msra.mxu1 %v1940_v17  ;;  %v1828_v17 = vmax.f32 %v1826_v3, %v1827_v6  ;;  %v2000_v3 = vld [vmem:[%s4627_s28 + $0xd0] sm:$0xff]  ;;  %v1999_v6 = vld [vmem:[%s4627_s28 + $0xc8] sm:$0xff] }
 0x49e   : > { %2111 = vmatprep.subr.mxu1 %v1939_v52  ;;  %v1954_v52 = vld [vmem:[%s4629_s19 + $0x160] sm:$0xff] }
 0x49f   : > { %2112 = vmatpush1.msra.mxu1 %v1938_v30  ;;  %v1819_v30 = vmax.f32 %v1817_v44, %v1818_v47  ;;  %v1998_v47 = vld [vmem:[%s4627_s28 + $0xc0] sm:$0xff] }
 0x4a0   : > { %2113 = vmatprep.subr.mxu1 %v1937_v26  ;;  %v1953_v26 = vld [vmem:[%s4629_s19 + $0x158] sm:$0xff] }
 0x4a1   : > { %2114 = vmatpush1.msra.mxu1 %v1936_v33  ;;  %v1829_v33 = vrot.slane %v1828_v17, 4 }
 0x4a2   : > { %2115 = vmatprep.subr.mxu1 %v1935_v61  ;;  %v1952_v61 = vld [vmem:[%s4629_s19 + $0x150] sm:$0xff] }
 0x4a3   : > { %2116 = vmatpush1.msra.mxu1 %v1934_v34  ;;  %v1820_v34 = vrot.slane %v1819_v30, 4 }
 0x4a4   : > { %2117 = vmatprep.subr.mxu1 %v1933_v35  ;;  %v1951_v35 = vld [vmem:[%s4629_s19 + $0x148] sm:$0xff] }
 0x4a5   : > { %2118 = vmatpush1.msra.mxu1 %v1932_v9  ;;  %v1830_v9 = vmax.f32 %v1828_v17, %v1829_v33  ;;  %v1996_v17 = vld [vmem:[%s4627_s28 + $0xb0] sm:$0xff]  ;;  %v1993_v33 = vld [vmem:[%s4627_s28 + $0x98] sm:$0xff] }
 0x4a6   : > { %2119 = vmatprep.subr.mxu1 %v1931_v62  ;;  %v1950_v62 = vld [vmem:[%s4629_s19 + $0x140] sm:$0xff] }
 0x4a7   : > { %2120 = vmatpush1.msra.mxu1 %v1930_v38  ;;  %v1821_v38 = vmax.f32 %v1819_v30, %v1820_v34  ;;  %v1991_v34 = vld [vmem:[%s4627_s28 + $0x88] sm:$0xff] }
 0x4a8   : > { %2121 = vmatprep.subr.mxu1 %v1929_v28  ;;  %v1949_v28 = vld [vmem:[%s4629_s19 + $0x138] sm:$0xff] }
 0x4a9   : > { %2122 = vmatpush1.msra.mxu1 %v1928_v39  ;;  %v1831_v39 = vrot.slane %v1830_v9, 2 }
 0x4aa   : > { %2123 = vmatprep.subr.mxu1 %v1927_v63  ;;  %v1948_v63 = vld [vmem:[%s4629_s19 + $0x130] sm:$0xff] }
 0x4ab   : > { %2124 = vmatpush1.msra.mxu1 %v1926_v18  ;;  %v1822_v18 = vrot.slane %v1821_v38, 2 }
 0x4ac   : > { %2125 = vmatprep.subr.mxu1 %v1925_v8  ;;  %v1947_v8 = vld [vmem:[%s4629_s19 + $0x128] sm:$0xff] }
 0x4ad   : > { %2126 = vmatpush1.msra.mxu1 %v1924_v15  ;;  %v1832_v15 = vmax.f32 %v1830_v9, %v1831_v39  ;;  %v1988_v9 = vld [vmem:[%s4627_s28 + $0x70] sm:$0xff] }
 0x4ae   : > { %2127 = vmatprep.subr.mxu1 %v1923_v0  ;;  %v1946_v0 = vld [vmem:[%s4629_s19 + $0x120] sm:$0xff]  ;;  %v1984_v39 = vld [vmem:[%s4627_s28 + $0x50] sm:$0xff] }
 0x4af   : > { %2128 = vmatpush1.msra.mxu1 %v1922_v1  ;;  %v1823_v1 = vmax.f32 %v1821_v38, %v1822_v18  ;;  %v1986_v38 = vld [vmem:[%s4627_s28 + $0x60] sm:$0xff] }
 0x4b0   : > { %2129 = vmatprep.subr.mxu1 %v1921_v14  ;;  %v1945_v14 = vld [vmem:[%s4629_s19 + $0x118] sm:$0xff]  ;;  %v1982_v18 = vld [vmem:[%s4627_s28 + $0x40] sm:$0xff] }
 0x4b1   : > { %2130 = vmatpush1.msra.mxu1 %v1920_v4  ;;  %v1833_v4 = vrot.slane %v1832_v15, 1 }
 0x4b2   : > { %2131 = vmatprep.subr.mxu1 %v1919_v10  ;;  %v1944_v10 = vld [vmem:[%s4629_s19 + $0x110] sm:$0xff] }
 0x4b3   : > { %2132 = vmatpush1.msra.mxu1 %v1918_v11  ;;  %v1824_v11 = vrot.slane %v1823_v1, 1 }
 0x4b4   : > { %2133 = vmatprep.subr.mxu1 %v1917_v48  ;;  %v1943_v48 = vld [vmem:[%s4629_s19 + $0x108] sm:$0xff] }
 0x4b5   : > { %2134 = vmatpush1.msra.mxu1 %v1916_v45  ;;  %v1834_v45 = vmax.f32 %v1832_v15, %v1833_v4  ;;  %v1980_v15 = vld [vmem:[%s4627_s28 + $0x30] sm:$0xff] }
 0x4b6   : > { %2135 = vmatprep.subr.mxu1 %v1915_v49  ;;  %v1942_v49 = vld [vmem:[%s4629_s19 + $0x100] sm:$0xff]  ;;  %v1976_v4 = vld [vmem:[%s4627_s28 + $0x10] sm:$0xff] }
 0x4b7   : > { %2136 = vmatpush1.msra.mxu1 %v1914_v50  ;;  %v1825_v50 = vmax.f32 %v1823_v1, %v1824_v11  ;;  %2173 = vmatprep.mubr.f32.mxu1 %v1834_v45  ;;  %v1978_v1 = vld [vmem:[%s4627_s28 + $0x20] sm:$0xff]  ;;  %v2036_v45 = vld [vmem:[%s4627_s28 + $0x1f0] sm:$0xff] }
 0x4b8   : > { %2137 = vmatprep.subr.mxu1 %v1913_v7  ;;  %v1974_v11 = vld [vmem:[%s4627_s28] sm:$0xff] }
 0x4b9   : > { %2138 = vmatpush1.msra.mxu1 %v1912_v25 }
 0x4ba   : > { %2139 = vmatprep.subr.mxu1 %v1911_v31 }
 0x4bb   : > { %2140 = vmatpush1.msra.mxu1 %v1910_v57 }
 0x4bc   : > { %2141 = vmatprep.subr.mxu1 %v1973_v5 }
 0x4bd   : > { %2142 = vmatpush2.msra.mxu1 %v1972_v37 }
 0x4be   : > { %2143 = vmatprep.subr.mxu1 %v1971_v23 }
 0x4bf   : > { %2144 = vmatpush2.msra.mxu1 %v1970_v55 }
 0x4c0   : > { %2145 = vmatprep.subr.mxu1 %v1969_v56 }
 0x4c1   : > { %2146 = vmatpush2.msra.mxu1 %v1968_v42 }
 0x4c2   : > { %2147 = vmatprep.subr.mxu1 %v1967_v43 }
 0x4c3   : > { %2148 = vmatpush2.msra.mxu1 %v1966_v53 }
 0x4c4   : > { %2149 = vmatprep.subr.mxu1 %v1965_v54 }
 0x4c5   : > { %2150 = vmatpush2.msra.mxu1 %v1964_v27  ;;  %v2004_v27 = vld [vmem:[%s4627_s28 + $0xf0] sm:$0xff] }
 0x4c6   : > { %2151 = vmatprep.subr.mxu1 %v1963_v12 }
 0x4c7   : > { %2152 = vmatpush2.msra.mxu1 %v1962_v13  ;;  %v2003_v13 = vld [vmem:[%s4627_s28 + $0xe8] sm:$0xff] }
 0x4c8   : > { %2153 = vmatprep.subr.mxu1 %v1961_v29 }
 0x4c9   : > { %2154 = vmatpush2.msra.mxu1 %v1960_v32 }
 0x4ca   : > { %2155 = vmatprep.subr.mxu1 %v1959_v19  ;;  %v2002_v19 = vld [vmem:[%s4627_s28 + $0xe0] sm:$0xff] }
 0x4cb   : > { %2156 = vmatpush2.msra.mxu1 %v1958_v40 }
 0x4cc   : > { %2157 = vmatprep.subr.mxu1 %v1957_v58  ;;  %v2001_v58 = vld [vmem:[%s4627_s28 + $0xd8] sm:$0xff] }
 0x4cd   : > { %2158 = vmatpush2.msra.mxu1 %v1956_v16 }
 0x4ce   : > { %2159 = vmatprep.subr.mxu1 %v1955_v51  ;;  %v1997_v51 = vld [vmem:[%s4627_s28 + $0xb8] sm:$0xff] }
 0x4cf   : > { %2160 = vmatpush2.msra.mxu1 %v1954_v52  ;;  %v1995_v52 = vld [vmem:[%s4627_s28 + $0xa8] sm:$0xff] }
 0x4d0   : > { %2161 = vmatprep.subr.mxu1 %v1953_v26  ;;  %v1994_v26 = vld [vmem:[%s4627_s28 + $0xa0] sm:$0xff] }
 0x4d1   : > { %2162 = vmatpush2.msra.mxu1 %v1952_v61  ;;  %v1992_v61 = vld [vmem:[%s4627_s28 + $0x90] sm:$0xff] }
 0x4d2   : > { %2163 = vmatprep.subr.mxu1 %v1951_v35  ;;  %v1989_v35 = vld [vmem:[%s4627_s28 + $0x78] sm:$0xff] }
 0x4d3   : > { %2164 = vmatpush2.msra.mxu1 %v1950_v62  ;;  %v1987_v62 = vld [vmem:[%s4627_s28 + $0x68] sm:$0xff] }
 0x4d4   : > { %2165 = vmatprep.subr.mxu1 %v1949_v28  ;;  %v1985_v28 = vld [vmem:[%s4627_s28 + $0x58] sm:$0xff] }
 0x4d5   : > { %2166 = vmatpush2.msra.mxu1 %v1948_v63  ;;  %v1983_v63 = vld [vmem:[%s4627_s28 + $0x48] sm:$0xff] }
 0x4d6   : > { %2167 = vmatprep.subr.mxu1 %v1947_v8  ;;  %v1981_v8 = vld [vmem:[%s4627_s28 + $0x38] sm:$0xff] }
 0x4d7   : > { %2168 = vmatpush2.msra.mxu1 %v1946_v0  ;;  %v1979_v0 = vld [vmem:[%s4627_s28 + $0x28] sm:$0xff] }
 0x4d8   : > { %2169 = vmatprep.subr.mxu1 %v1945_v14  ;;  %v1977_v14 = vld [vmem:[%s4627_s28 + $0x18] sm:$0xff] }
 0x4d9   : > { %2170 = vmatpush2.msra.mxu1 %v1944_v10  ;;  %v1975_v10 = vld [vmem:[%s4627_s28 + $0x8] sm:$0xff] }
 0x4da   : > { %2171 = vmatprep.subr.mxu1 %v1943_v48  ;;  %v2037_v48 = vld [vmem:[%s4627_s28 + $0x1f8] sm:$0xff] }
 0x4db   : > { %2172 = vmatpush2.msra.mxu1 %v1942_v49  ;;  %v2035_v49 = vld [vmem:[%s4627_s28 + $0x1e8] sm:$0xff] }
 0x4dc   : > { %2174 = vmatmul.mubr.f32.vlgmr.msra.gmra.mxu1 %v1825_v50  ;;  %v2034_v50 = vld [vmem:[%s4627_s28 + $0x1e0] sm:$0xff] }
 0x4e8   : > { %v2590_v7 = vpop.f32.mrf.mxu1 }
 0x4e9   : > { %v1583_v25 = vmul.f32 0.5, %v2590_v7  ;;  %v2033_v7 = vld [vmem:[%s4627_s28 + $0x1d8] sm:$0xff] }
 0x4ea   : > { %v1563_v31 = vpop.f32.mrf.mxu1 }
 0x4eb   : > { %2816 = vtanh.f32 %v1583_v25  ;;  %v1582_v57 = vmul.f32 0.5, %v1563_v31  ;;  %v2032_v25 = vld [vmem:[%s4627_s28 + $0x1d0] sm:$0xff]  ;;  %v2031_v31 = vld [vmem:[%s4627_s28 + $0x1c8] sm:$0xff] }
 0x4ec   : > { %v2593_v5 = vpop.f32.mrf.mxu1 }
 0x4ed   : > { %2818 = vtanh.f32 %v1582_v57  ;;  %v1585_v23 = vmul.f32 0.5, %v2593_v5  ;;  %v2030_v57 = vld [vmem:[%s4627_s28 + $0x1c0] sm:$0xff]  ;;  %v2029_v5 = vld [vmem:[%s4627_s28 + $0x1b8] sm:$0xff] }
 0x4ee   : > { %v1573_v37 = vpop.f32.mrf.mxu1 }
 0x4ef   : > { %v1584_v55 = vmul.f32 0.5, %v1573_v37  ;;  %v2028_v37 = vld [vmem:[%s4627_s28 + $0x1b0] sm:$0xff] }
 0x4f1   : > { %2820 = vtanh.f32 %v1584_v55  ;;  %v2026_v55 = vld [vmem:[%s4627_s28 + $0x1a0] sm:$0xff] }
 0x4f2   : > { %2822 = vtanh.f32 %v1585_v23  ;;  %v2027_v23 = vld [vmem:[%s4627_s28 + $0x1a8] sm:$0xff] }
 0x4f8   : > { %v2817_v56 = vpop.eup %2816 }
 0x4f9   : > { %v1591_v43 = vmul.f32 0.5, %v2817_v56  ;;  %v2025_v56 = vld [vmem:[%s4627_s28 + $0x198] sm:$0xff] }
 0x4fa   : > { %v2819_v42 = vpop.eup %2818 }
 0x4fb   : > { %v1590_v53 = vmul.f32 0.5, %v2819_v42  ;;  %v1595_v29 = vadd.f32 0.5, %v1591_v43  ;;  %v2024_v42 = vld [vmem:[%s4627_s28 + $0x190] sm:$0xff]  ;;  %v2023_v43 = vld [vmem:[%s4627_s28 + $0x188] sm:$0xff] }
 0x4fd   : > { %v1594_v54 = vadd.f32 0.5, %v1590_v53  ;;  %v2022_v53 = vld [vmem:[%s4627_s28 + $0x180] sm:$0xff] }
 0x4fe   : > { %v2821_v12 = vpop.eup %2820 }
 0x4ff   : > { %v1592_v32 = vmul.f32 0.5, %v2821_v12  ;;  %2391 = vmatmul.mubr.msk.f32.vlgmr.msra.gmra.mxu0 %vm1602_vm6, %v1594_v54  ;;  %v2823_v40 = vpop.eup %2822  ;;  %v2021_v54 = vld [vmem:[%s4627_s28 + $0x178] sm:$0xff]  ;;  %v2019_v12 = vld [vmem:[%s4627_s28 + $0x168] sm:$0xff] }
 0x500   : > { %1790 = vmatprep.mubr.f32.mxu0 %v3058_v60  ;;  %2039 = vmatpush1.msra.mxu0 %v2004_v27  ;;  %v1593_v16 = vmul.f32 0.5, %v2823_v40  ;;  %v2020_v27 = vld [vmem:[%s4627_s28 + $0x170] sm:$0xff]  ;;  %v2014_v40 = vld [vmem:[%s4627_s28 + $0x140] sm:$0xff] }
 0x501   : > { %2040 = vmatprep.subr.mxu0 %v2003_v13  ;;  %v1596_v44 = vadd.f32 0.5, %v1592_v32  ;;  %v2018_v13 = vld [vmem:[%s4627_s28 + $0x160] sm:$0xff]  ;;  %v2016_v32 = vld [vmem:[%s4627_s28 + $0x150] sm:$0xff] }
 0x502   : > { %2041 = vmatpush1.msra.mxu0 %v2002_v19  ;;  %v1597_v30 = vadd.f32 0.5, %v1593_v16  ;;  %v2015_v19 = vld [vmem:[%s4627_s28 + $0x148] sm:$0xff]  ;;  %v2010_v16 = vld [vmem:[%s4627_s28 + $0x120] sm:$0xff] }
 0x503   : > { %2392 = vmatmul.mubr.msk.f32.gmra.mxu0 %vm1602_vm6, %v1595_v29  ;;  %2042 = vmatprep.subr.mxu0 %v2001_v58  ;;  %v2017_v29 = vld [vmem:[%s4627_s28 + $0x158] sm:$0xff] }
 0x504   : > { %1796 = vmatprep.mubr.f32.mxu0 %v3058_v60  ;;  %2043 = vmatpush1.msra.mxu0 %v2000_v3  ;;  %v2013_v58 = vld [vmem:[%s4627_s28 + $0x138] sm:$0xff]  ;;  %v2012_v3 = vld [vmem:[%s4627_s28 + $0x130] sm:$0xff] }
 0x505   : > { %2044 = vmatprep.subr.mxu0 %v1999_v6  ;;  %v2011_v6 = vld [vmem:[%s4627_s28 + $0x128] sm:$0xff] }
 0x506   : > { %2045 = vmatpush1.msra.mxu0 %v1998_v47  ;;  %v2008_v47 = vld [vmem:[%s4627_s28 + $0x110] sm:$0xff] }
 0x507   : > { %2393 = vmatmul.mubr.msk.f32.gmra.mxu0 %vm1602_vm6, %v1596_v44  ;;  %2046 = vmatprep.subr.mxu0 %v1997_v51  ;;  %v2009_v44 = vld [vmem:[%s4627_s28 + $0x118] sm:$0xff]  ;;  %v2007_v51 = vld [vmem:[%s4627_s28 + $0x108] sm:$0xff] }
 0x508   : > { %1802 = vmatprep.mubr.f32.mxu0 %v3058_v60  ;;  %2047 = vmatpush1.msra.mxu0 %v1996_v17  ;;  %v1990_v60 = vld [vmem:[%s4627_s28 + $0x80] sm:$0xff] }
 0x509   : > { %2048 = vmatprep.subr.mxu0 %v1995_v52  ;;  %v2006_v17 = vld [vmem:[%s4627_s28 + $0x100] sm:$0xff] }
 0x50a   : > { %2049 = vmatpush1.msra.mxu0 %v1994_v26 }
 0x50b   : > { %2394 = vmatmul.mubr.msk.f32.gmra.mxu0 %vm1602_vm6, %v1597_v30  ;;  %2050 = vmatprep.subr.mxu0 %v1993_v33 }
 0x50c   : > { %2051 = vmatpush1.msra.mxu0 %v1992_v61 }
 0x50d   : > { %2052 = vmatprep.subr.mxu0 %v1991_v34 }
 0x50e   : > { %2053 = vmatpush1.msra.mxu0 %v1990_v60 }
 0x50f   : > { %2054 = vmatprep.subr.mxu0 %v1989_v35 }
 0x510   : > { %2055 = vmatpush1.msra.mxu0 %v1988_v9 }
 0x511   : > { %2056 = vmatprep.subr.mxu0 %v1987_v62 }
 0x512   : > { %2057 = vmatpush1.msra.mxu0 %v1986_v38 }
 0x513   : > { %2058 = vmatprep.subr.mxu0 %v1985_v28 }
 0x514   : > { %2059 = vmatpush1.msra.mxu0 %v1984_v39 }
 0x515   : > { %2060 = vmatprep.subr.mxu0 %v1983_v63 }
 0x516   : > { %2061 = vmatpush1.msra.mxu0 %v1982_v18 }
 0x517   : > { %2062 = vmatprep.subr.mxu0 %v1981_v8 }
 0x518   : > { %2063 = vmatpush1.msra.mxu0 %v1980_v15 }
 0x519   : > { %2064 = vmatprep.subr.mxu0 %v1979_v0 }
 0x51a   : > { %2065 = vmatpush1.msra.mxu0 %v1978_v1 }
 0x51b   : > { %2066 = vmatprep.subr.mxu0 %v1977_v14 }
 0x51c   : > { %2067 = vmatpush1.msra.mxu0 %v1976_v4 }
 0x51d   : > { %2068 = vmatprep.subr.mxu0 %v1975_v10 }
 0x51e   : > { %2069 = vmatpush1.msra.mxu0 %v1974_v11 }
 0x51f   : > { %2070 = vmatprep.subr.mxu0 %v2037_v48 }
 0x520   : > { %2071 = vmatpush2.msra.mxu0 %v2036_v45 }
 0x521   : > { %2072 = vmatprep.subr.mxu0 %v2035_v49 }
 0x522   : > { %2073 = vmatpush2.msra.mxu0 %v2034_v50  ;;  %v2197_v50 = vshrl.u32 %v768_v24, 7 }
 0x523   : > { %2074 = vmatprep.subr.mxu0 %v2033_v7 }
 0x524   : > { %2075 = vmatpush2.msra.mxu0 %v2032_v25 }
 0x525   : > { %2076 = vmatprep.subr.mxu0 %v2031_v31 }
 0x526   : > { %2077 = vmatpush2.msra.mxu0 %v2030_v57 }
 0x527   : > { %2078 = vmatprep.subr.mxu0 %v2029_v5 }
 0x528   : > { %2079 = vmatpush2.msra.mxu0 %v2028_v37 }
 0x529   : > { %2080 = vmatprep.subr.mxu0 %v2027_v23  ;;  %v2198_v23 = vsub.s32 0, %v2197_v50 }
 0x52a   : > { %2081 = vmatpush2.msra.mxu0 %v2026_v55 }
 0x52b   : > { %2082 = vmatprep.subr.mxu0 %v2025_v56 }
 0x52c   : > { %2083 = vmatpush2.msra.mxu0 %v2024_v42 }
 0x52d   : > { %2084 = vmatprep.subr.mxu0 %v2023_v43 }
 0x52e   : > { %2085 = vmatpush2.msra.mxu0 %v2022_v53 }
 0x52f   : > { %2086 = vmatprep.subr.mxu0 %v2021_v54 }
 0x530   : > { %2087 = vmatpush2.msra.mxu0 %v2020_v27 }
 0x531   : > { %2088 = vmatprep.subr.mxu0 %v2019_v12 }
 0x532   : > { %2089 = vmatpush2.msra.mxu0 %v2018_v13 }
 0x533   : > { %2090 = vmatprep.subr.mxu0 %v2017_v29 }
 0x534   : > { %2091 = vmatpush2.msra.mxu0 %v2016_v32 }
 0x535   : > { %2092 = vmatprep.subr.mxu0 %v2015_v19 }
 0x536   : > { %2093 = vmatpush2.msra.mxu0 %v2014_v40 }
 0x537   : > { %2094 = vmatprep.subr.mxu0 %v2013_v58 }
 0x538   : > { %2095 = vmatpush2.msra.mxu0 %v2012_v3 }
 0x539   : > { %2096 = vmatprep.subr.mxu0 %v2011_v6 }
 0x53a   : > { %2097 = vmatpush2.msra.mxu0 %v2010_v16 }
 0x53b   : > { %2098 = vmatprep.subr.mxu0 %v2009_v44 }
 0x53c   : > { %2099 = vmatpush2.msra.mxu0 %v2008_v47 }
 0x53d   : > { %2100 = vmatprep.subr.mxu0 %v2007_v51 }
 0x53e   : > { %2101 = vmatpush2.msra.mxu0 %v2006_v17 }
 0x54c   : > { %v1681_v52 = vpop.f32.mrf.mxu1 }
 0x54e   : > { %v1683_v30 = vpop.f32.mrf.mxu1 }
 0x550   : > { %v1687_v26 = vpop.f32.mrf.mxu1 }
 0x552   : > { %v1689_v33 = vpop.f32.mrf.mxu1 }
 0x554   : > { %v1693_v61 = vpop.f32.mrf.mxu1 }
 0x556   : > { %v1695_v34 = vpop.f32.mrf.mxu1 }
 0x558   : > { %v1699_v60 = vpop.f32.mrf.mxu1 }
 0x55a   : > { %v1701_v35 = vpop.f32.mrf.mxu1 }
 0x55c   : > { %v1905_v9 = vpop.f32.mrf.mxu1 }
 0x55e   : > { %v1907_v62 = vpop.f32.mrf.mxu1 }
 0x55f   : > { %2102 = vmatprep.mubr.f32.mxu0 %v1907_v62 }
 0x560   : > { %2103 = vmatmul.mubr.f32.vlgmr.msra.gmra.mxu0 %v1905_v9 }
 0x59c   : > { %v2175_v1 = vpop.f32.mrf.mxu1 }
 0x59e   : > { %v2177_v11 = vpop.f32.mrf.mxu1 }
 0x5bf   : > { %v1786_v38 = vpop.f32.mrf.mxu0 }
 0x5c0   : > { %v1809_v7 = vmul.f32 %v1786_v38, %v1681_v52 }
 0x5c1   : > { %v1788_v28 = vpop.f32.mrf.mxu0 }
 0x5c2   : > { %v1810_v56 = vmul.f32 %v1788_v28, %v1683_v30  ;;  %v2188_v42 = vmul.f32 %v4090_v46, %v1809_v7 }
 0x5c3   : > { %v1792_v39 = vpop.f32.mrf.mxu0 }
 0x5c4   : > { %v1811_v31 = vmul.f32 %v1792_v39, %v1687_v26  ;;  %v2189_v40 = vmul.f32 %v4086_v59, %v1810_v56 }
 0x5c5   : > { %v1794_v63 = vpop.f32.mrf.mxu0 }
 0x5c6   : > { %v2190_v54 = vmul.f32 %v4079_v2, %v1811_v31  ;;  %v1812_v27 = vmul.f32 %v1794_v63, %v1689_v33 }
 0x5c7   : > { %v1798_v18 = vpop.f32.mrf.mxu0 }
 0x5c8   : > { %v1813_v57 = vmul.f32 %v1798_v18, %v1693_v61  ;;  %v2191_v2 = vmul.f32 %v4074_v21, %v1812_v27 }
 0x5c9   : > { %v1800_v8 = vpop.f32.mrf.mxu0 }
 0x5ca   : > { %v1814_v12 = vmul.f32 %v1800_v8, %v1695_v34  ;;  %v2192_v13 = vmul.f32 %v4069_v20, %v1813_v57 }
 0x5cb   : > { %v1804_v15 = vpop.f32.mrf.mxu0 }
 0x5cc   : > { %v1815_v5 = vmul.f32 %v1804_v15, %v1699_v60  ;;  %v2193_v16 = vmul.f32 %v4065_v41, %v1814_v12 }
 0x5cd   : > { %v1806_v0 = vpop.f32.mrf.mxu0 }
 0x5ce   : > { %v1816_v24 = vmul.f32 %v1806_v0, %v1701_v35  ;;  %v2194_v29 = vmul.f32 %v4061_v36, %v1815_v5 }
 0x5d0   : > { %v2195_v44 = vmul.f32 %v4051_v22, %v1816_v24 }
 0x620   : > { %v2104_v14 = vpop.f32.mrf.mxu0 }
 0x621   : > { %v2176_v4 = vadd.f32 %v2175_v1, %v2104_v14 }
 0x622   : > { %v2106_v10 = vpop.f32.mrf.mxu0 }
 0x623   : > { %v2180_v48 = vmul.f32 0.5, %v2176_v4  ;;  %v2178_v45 = vadd.f32 %v2177_v11, %v2106_v10 }
 0x625   : > { %2824 = vtanh.f32 %v2180_v48  ;;  %v2181_v49 = vmul.f32 0.5, %v2178_v45 }
 0x627   : > { %2826 = vtanh.f32 %v2181_v49 }
 0x632   : > { %v2825_v25 = vpop.eup %2824 }
 0x633   : > { %v2184_v37 = vmul.f32 0.5, %v2825_v25 }
 0x634   : > { %v2827_v55 = vpop.eup %2826 }
 0x635   : > { %v2186_v43 = vadd.f32 0.5, %v2184_v37  ;;  %v2185_v53 = vmul.f32 0.5, %v2827_v55 }
 0x637   : > { %v2199_v32 = vrot.slane %v2186_v43, %v2198_v23  ;;  %v2187_v19 = vadd.f32 0.5, %v2185_v53 }
 0x639   : > { %v2204_v58 = vmul.f32 %v2199_v32, %v2188_v42  ;;  %v2206_v3 = vmul.f32 %v2199_v32, %v2190_v54  ;;  %v2208_v46 = vmul.f32 %v2199_v32, %v2192_v13  ;;  %v2210_v6 = vmul.f32 %v2199_v32, %v2194_v29 }
 0x63a   : > { %v2203_v20 = vrot.slane %v2187_v19, %v2198_v23 }
 0x63b   : > { %2212 = vst [vmem:[%s618_s15] sm:$0xff] %v2204_v58  ;;  %2214 = vst [vmem:[%s618_s15 + $0x10] sm:$0xff] %v2206_v3 }
 0x63c   : > { %2216 = vst [vmem:[%s618_s15 + $0x20] sm:$0xff] %v2208_v46  ;;  %2218 = vst [vmem:[%s618_s15 + $0x30] sm:$0xff] %v2210_v6  ;;  %v2205_v36 = vmul.f32 %v2203_v20, %v2189_v40  ;;  %v2207_v59 = vmul.f32 %v2203_v20, %v2191_v2  ;;  %v2209_v47 = vmul.f32 %v2203_v20, %v2193_v16 }
 0x63d   : > { %v2211_v21 = vmul.f32 %v2203_v20, %v2195_v44 }
 0x63e   : > { %2213 = vst [vmem:[%s618_s15 + $0x8] sm:$0xff] %v2205_v36  ;;  %2215 = vst [vmem:[%s618_s15 + $0x18] sm:$0xff] %v2207_v59 }
 0x63f   : > { %2217 = vst [vmem:[%s618_s15 + $0x28] sm:$0xff] %v2209_v47  ;;  %2219 = vst [vmem:[%s618_s15 + $0x38] sm:$0xff] %v2211_v21 }
 0x640   : > { %2983 = shalt.err (!%p2980_p5)
}
 0x641   : > { %s2984_s2 = scalar_lea.hbm %s4508_s18, 1024  ;;  %s2988_s21 = scalar_lea.hbm %s4632_s13, 2048 }
 0x642   : > { %p2985_p2 = scmp.ne.s32.totalorder %s4508_s18, %s2984_s2  ;;  %p2989_p7 = scmp.lt.s32.totalorder %s4508_s18, %s4632_s13 }
 0x643   : > { %p2990_p10 = scmp.lt.s32.totalorder %s2988_s21, %s2984_s2 }
 0x644   : > { %p2986_p12 = pnand %p2985_p2, %p3253_p9 }
 0x645   : > { %p2991_p13 = por %p2990_p10, %p2989_p7 }
 0x646   : > { %p2987_p11 = pneg %p2986_p12 }
 0x648   : > { %p2992_p0 = pnand %p2991_p13, %p2987_p11 }
 0x64a   : > { %2995 = shalt.err (!%p2992_p0)
}
 0x64b   : > { %s3063_s0 = smov 256  }
 0x64c   : > { %2610 = dma.vmem_to_hbm [thread:$0]  (%p3253_p9), %s4510_s20, 1024, %s4508_s18, %s2221_s12, %s3063_s0, %s3063_s0, %s3055_s27  }
 0x64d PF: > { %s4633_s17 = sld [smem:[#allocation17_spill]]  ;;  %p4636_p3 = scmp.ge.s32.totalorder %s3046_s24, 2 }
 0x64e   : > { %s4634_s3 = sld [smem:[#allocation19_spill]] }
 0x653   : > { %s2249_s16 = sand.u32 1, %s4633_s17  }
 0x654   : > { %p4635_p1 = scmp.ne.s32.totalorder %s4634_s3, 0  ;;  %s2250_s23 = scalar_lea.sflag [#allocation4], %s2249_s16 }
 0x656   : > { %p2630_p6 = pnand %p4636_p3, %p4635_p1 }
 0x658   : > { %p2631_p4 = pneg %p2630_p6 }
 0x65a   : > { %3029 = dma.done.wait (%p2631_p4), %s2250_s23, 1024  }
 0x65b   : > { %3031 = vsyncadd (%p2631_p4), %s2250_s23, 4294966272  ;;  %s4637_s24 = sld [smem:[#allocation20_spill]]  ;;  %s4640_s21 = smov %s3038_s22 }
 0x65c   : > { %s4638_s29 = sld [smem:[#allocation18_spill]] }
 0x65d   : > { %s4639_s23 = sld [smem:[#allocation21_spill]] }
 0x661   : > { %p33_p8 = scmp.ge.s32.totalorder %s4637_s24, 4  }
 0x662   : > { %s4641_s22 = smov %s4638_s29 }
 0x663   :  { %35 = sbr.rel (!%p33_p8) target bundleno = 18 (0x12), region = 154 }
 0x668   :  { %2255 = vsyncpa [#allocation3], 1 }
 0x669   :  { %2257 = vsyncpa [#allocation3 + $0x1], 1 }
 0x66a   :  { %2258 = vsyncpa [#allocation6], 1 }
 0x66b   :  { %2260 = vsyncpa [#allocation6 + $0x1], 1 }
 0x66c   :  { %2261 = vsyncpa [#allocation9], 1 }
 0x66d   :  { %2262 = vsyncpa [#allocation4], 1 }
 0x66e   :  { %2264 = vsyncpa [#allocation4 + $0x1], 1 }

</bundles_post_ra>
